<compile_context>
chip_gen: v5e
topology: v5e:2x2
jax: 0.10.0
libtpu: 0.0.40
codegen_flags: <defaults>
</compile_context>

<pallas_src>
import functools

import jax
import jax.numpy as jnp
from jax.experimental import pallas as pl
from jax.experimental.pallas import tpu as pltpu

EPS = 1e-5


# ---------------------------------------------------------------------------
# Fused Pallas kernel (single block: everything lives in VMEM)
# ---------------------------------------------------------------------------
def _res_block_kernel(x_ref, wb1_ref, wb2_ref, p_ref, out_ref, pad_ref,
                      *, N, H, W, C):
    """conv3x3 -> BN -> PReLU -> conv3x3 -> BN -> residual, lane-dense layout.

    x_ref   : (N*H, W*C)          f32   activation, lane-dense (w-major, c-minor)
    wb*_ref : (3, (W+2)*C, W*C)   bf16  block-banded conv weights, one band per dh
    p_ref   : (8, C)              f32   rows: gamma1, beta1, gamma2, beta2, alpha
    out_ref : (N*H, W*C)          f32
    pad_ref : (N, H+2, (W+2)*C)   bf16  shared zero-padded activation scratch
    """
    M = N * H * W
    WC = W * C
    WpC = (W + 2) * C
    inv_m = 1.0 / M

    def lane(row):                       # (1, C) channel row -> (1, W*C) lane vector
        return jnp.tile(row, (1, W))

    def channel_reduce(v):               # (1, W*C) -> (1, C): sum the W lane groups
        r = v[:, 0:C]
        for w in range(1, W):            # static unroll; tiny lane-slice adds
            r = r + v[:, w * C:(w + 1) * C]
        return r

    def write_interior(act_f32):
        pad_ref[:, 1:H + 1, C:C + WC] = (
            act_f32.astype(jnp.bfloat16).reshape(N, H, WC))

    def conv3x3(wb_ref):
        # out[(n,h), (w,co)] = sum_dh  pad[(n,h+dh), :] @ band[dh]
        acc = jnp.zeros((N * H, WC), jnp.float32)
        for dh in range(3):              # static unroll -> 3 MXU matmuls
            a = pad_ref[:, dh:dh + H, :].reshape(N * H, WpC)   # bf16 operand
            acc = acc + jnp.dot(a, wb_ref[dh],
                                preferred_element_type=jnp.float32)
        return acc                        # (N*H, W*C) f32

    def batchnorm(y, gamma_row, beta_row):
        # Training-mode BN over all M = N*H*W positions, centered two-pass
        # variance (more stable than E[y^2] - E[y]^2).
        mean_c = channel_reduce(jnp.sum(y, axis=0, keepdims=True)) * inv_m   # (1,C)
        d = y - lane(mean_c)
        var_c = channel_reduce(jnp.sum(d * d, axis=0, keepdims=True)) * inv_m
        scale_c = gamma_row * jax.lax.rsqrt(var_c + EPS)
        shift_c = beta_row - mean_c * scale_c
        return y * lane(scale_c) + lane(shift_c)

    x = x_ref[...]                                            # (N*H, W*C) f32

    # Zero ONLY the 1-pixel halo of pad_ref; the interior is always overwritten.
    zrow = jnp.zeros((N, 1, WpC), jnp.bfloat16)
    zcol = jnp.zeros((N, H + 2, C), jnp.bfloat16)
    pad_ref[:, 0:1, :] = zrow
    pad_ref[:, H + 1:H + 2, :] = zrow
    pad_ref[:, :, 0:C] = zcol
    pad_ref[:, :, C + WC:WpC] = zcol

    # ---- stage 1: conv1 -> BN1 -> PReLU ------------------------------------
    write_interior(x)
    y = conv3x3(wb1_ref)
    y = batchnorm(y, p_ref[0:1, :], p_ref[1:2, :])
    alpha_l = lane(p_ref[4:5, :])
    y = jnp.where(y >= 0.0, y, alpha_l * y)                   # PReLU (single alpha)

    # ---- stage 2: conv2 -> BN2 -> residual add -----------------------------
    write_interior(y)                                         # halo still zero
    z = conv3x3(wb2_ref)
    z = batchnorm(z, p_ref[2:3, :], p_ref[3:4, :])

    out_ref[...] = z + x                                      # residual kept in f32


# ---------------------------------------------------------------------------
# Host-side helpers
# ---------------------------------------------------------------------------
def _banded_weights(w_hwio, W):
    """(3,3,Cin,Cout) HWIO -> (3, (W+2)*C, W*C) bf16 block-banded matmul weights.

    band[dh][(wpad)*C + ci, w*C + co] = w[dh, wpad-w, ci, co]  for 0 <= wpad-w <= 2.
    """
    C = w_hwio.shape[2]
    idx = jnp.arange(W)
    bands = []
    for dh in range(3):
        blocks = jnp.zeros((W + 2, W, C, C), jnp.float32)
        for dw in range(3):
            blocks = blocks.at[idx + dw, idx].set(w_hwio[dh, dw])
        bands.append(blocks.transpose(0, 2, 1, 3).reshape((W + 2) * C, W * C))
    return jnp.stack(bands).astype(jnp.bfloat16)


def _vmem_limit_bytes(N, H, W, C):
    M = N * H * W
    io = 2 * M * C * 4                                # x + out
    wts = 2 * 3 * (W + 2) * C * W * C * 2             # banded weights (bf16)
    pad = N * (H + 2) * (W + 2) * C * 2               # padded scratch (bf16)
    interm = 8 * M * C * 4                            # live f32 intermediates
    need = io + wts + pad + interm
    return int(min(max(2 * need, 16 * 2 ** 20), 64 * 2 ** 20))


def res_block_forward_nhwc(x_nhwc, params):
    """NHWC fast path (no layout transposes around the kernel)."""
    w1, b1, g1, be1, w2, b2, g2, be2, alpha = params
    del b1, b2  # conv bias before training-mode BN is cancelled by mean subtraction
    N, H, W, C = x_nhwc.shape
    WC = W * C

    wb1 = _banded_weights(w1, W)
    wb2 = _banded_weights(w2, W)

    # Packed per-channel params: rows [gamma1, beta1, gamma2, beta2, alpha, 0, 0, 0]
    p = jnp.zeros((8, C), jnp.float32)
    p = p.at[0].set(g1.reshape(C)).at[1].set(be1.reshape(C))
    p = p.at[2].set(g2.reshape(C)).at[3].set(be2.reshape(C))
    p = p.at[4].set(jnp.broadcast_to(alpha.reshape(-1), (C,)))

    x2d = x_nhwc.reshape(N * H, WC).astype(jnp.float32)       # lane-dense slab

    vmem = functools.partial(pl.BlockSpec, memory_space=pltpu.MemorySpace.VMEM)
    out = pl.pallas_call(
        functools.partial(_res_block_kernel, N=N, H=H, W=W, C=C),
        out_shape=jax.ShapeDtypeStruct((N * H, WC), jnp.float32),
        in_specs=[vmem(), vmem(), vmem(), vmem()],
        out_specs=vmem(),
        scratch_shapes=[
            pltpu.VMEM((N, H + 2, (W + 2) * C), jnp.bfloat16),  # padded activation
        ],
        compiler_params=pltpu.CompilerParams(
            vmem_limit_bytes=_vmem_limit_bytes(N, H, W, C)),
    )(x2d, wb1, wb2, p)
    return out.reshape(N, H, W, C)


@jax.jit
def res_block_forward(x_nchw, params):
    """PyTorch-layout wrapper: NCHW in, NCHW out."""
    x = jnp.transpose(x_nchw, (0, 2, 3, 1)).astype(jnp.float32)
    out = res_block_forward_nhwc(x, params)
    return jnp.transpose(out, (0, 3, 1, 2))


# ---------------------------------------------------------------------------
# Deterministic parameter init (shapes from the torch module __init__)
# ---------------------------------------------------------------------------
def init_params(key, filters):
    ks = jax.random.split(key, 8)
    fan_in = filters * 9
    bound = 1.0 / (fan_in ** 0.5)
    # conv weights stored HWIO: (kh, kw, Cin, Cout)
    w1 = jax.random.uniform(ks[0], (3, 3, filters, filters), jnp.float32, -bound, bound)
    b1 = jax.random.uniform(ks[1], (1, filters), jnp.float32, -bound, bound)
    w2 = jax.random.uniform(ks[2], (3, 3, filters, filters), jnp.float32, -bound, bound)
    b2 = jax.random.uniform(ks[3], (1, filters), jnp.float32, -bound, bound)
    # BN affine params (perturbed from default 1/0 so the path is exercised)
    g1 = 1.0 + 0.1 * jax.random.normal(ks[4], (1, filters), jnp.float32)
    be1 = 0.1 * jax.random.normal(ks[5], (1, filters), jnp.float32)
    g2 = 1.0 + 0.1 * jax.random.normal(ks[6], (1, filters), jnp.float32)
    be2 = 0.1 * jax.random.normal(ks[7], (1, filters), jnp.float32)
    alpha = jnp.full((1, 1), 0.25, jnp.float32)   # PReLU default (single param)
    return (w1, b1, g1, be1, w2, b2, g2, be2, alpha)


# ---------------------------------------------------------------------------
# Pure-JAX reference (torch forward semantics, training-mode BN)
# ---------------------------------------------------------------------------
def ref_forward(x_nchw, params, quantize_matmul_inputs=False):
    """If quantize_matmul_inputs, conv operands are rounded to bf16 first, which
    mirrors the kernel's bf16-operand / f32-accumulate MXU math."""
    w1, b1, g1, be1, w2, b2, g2, be2, alpha = params
    x = jnp.transpose(x_nchw, (0, 2, 3, 1)).astype(jnp.float32)
    if quantize_matmul_inputs:
        q = lambda a: a.astype(jnp.bfloat16).astype(jnp.float32)
    else:
        q = lambda a: a

    def conv(x, w, b):
        y = jax.lax.conv_general_dilated(
            q(x), q(w), (1, 1), 'SAME',
            dimension_numbers=('NHWC', 'HWIO', 'NHWC'),
            precision=jax.lax.Precision.HIGHEST)
        return y + b.reshape(1, 1, 1, -1)

    def bn(y, g, be):
        mean = jnp.mean(y, axis=(0, 1, 2), keepdims=True)
        var = jnp.mean(jnp.square(y - mean), axis=(0, 1, 2), keepdims=True)
        return ((y - mean) * jax.lax.rsqrt(var + EPS)
                * g.reshape(1, 1, 1, -1) + be.reshape(1, 1, 1, -1))

    y = conv(x, w1, b1)
    y = bn(y, g1, be1)
    y = jnp.where(y >= 0, y, alpha[0, 0] * y)
    z = conv(y, w2, b2)
    z = bn(z, g2, be2)
    return jnp.transpose(z + x, (0, 3, 1, 2))


if __name__ == "__main__":
    key = jax.random.PRNGKey(0)
    kx, kp = jax.random.split(key)

    N, C, H, W = 2, 8, 16, 16            # Res_block(filters=8) on 2x8x16x16 input
    x = jax.random.normal(kx, (N, C, H, W), jnp.float32)
    params = init_params(kp, C)

    out = jax.block_until_ready(res_block_forward(x, params))
    assert out.shape == (N, C, H, W)

    # 1) Same-math check: reference with bf16-rounded conv operands (exactly the
    #    kernel's MXU math: bf16 x bf16 -> f32 accumulate).
    ref_q = ref_forward(x, params, quantize_matmul_inputs=True)
    if not jnp.allclose(out, ref_q, atol=1e-2, rtol=1e-2):
        raise AssertionError(
            f"mismatch vs bf16-operand reference, max abs err = "
            f"{float(jnp.max(jnp.abs(out - ref_q)))}")

    # 2) Full-precision module semantics: deviation bounded by bf16 operand rounding.
    ref_f = ref_forward(x, params, quantize_matmul_inputs=False)
    if not jnp.allclose(out, ref_f, atol=1e-1, rtol=1e-1):
        raise AssertionError(
            f"mismatch vs f32 reference, max abs err = "
            f"{float(jnp.max(jnp.abs(out - ref_f)))}")

    print("KERNEL_OK")
</pallas_src>

<mosaic_0001>
module attributes {stable_mosaic.version = 11 : i64} {
  func.func @_res_block_kernel(%arg0: memref<32x128xf32, #tpu.memory_space<vmem>>, %arg1: memref<3x144x128xbf16, #tpu.memory_space<vmem>>, %arg2: memref<3x144x128xbf16, #tpu.memory_space<vmem>>, %arg3: memref<8x8xf32, #tpu.memory_space<vmem>>, %arg4: memref<32x128xf32, #tpu.memory_space<vmem>>, %arg5: memref<2x18x144xbf16, #tpu.memory_space<vmem>>) attributes {dimension_semantics = [], scalar_prefetch = 0 : i64, scratch_operands = 1 : i64, tpu.core_type = #tpu.core_type<tc>} {
    %c0 = arith.constant 0 : index
    %c0_0 = arith.constant 0 : index
    %0 = vector.load %arg0[%c0, %c0_0] : memref<32x128xf32, #tpu.memory_space<vmem>>, vector<32x128xf32>
    %cst = arith.constant 0.000000e+00 : bf16
    %1 = vector.broadcast %cst : bf16 to vector<2x1x144xbf16>
    %cst_1 = arith.constant 0.000000e+00 : bf16
    %2 = vector.broadcast %cst_1 : bf16 to vector<2x18x8xbf16>
    %c0_2 = arith.constant 0 : index
    %c0_3 = arith.constant 0 : index
    %c0_4 = arith.constant 0 : index
    %3 = vector.load %arg5[%c0_2, %c0_3, %c0_4] : memref<2x18x144xbf16, #tpu.memory_space<vmem>>, vector<2x1x144xbf16>
    tpu.vector_store %arg5[%c0_2, %c0_3, %c0_4], %1 {strides = array<i32>} : memref<2x18x144xbf16, #tpu.memory_space<vmem>>, vector<2x1x144xbf16>,
    %c0_5 = arith.constant 0 : index
    %c17 = arith.constant 17 : index
    %c0_6 = arith.constant 0 : index
    %4 = vector.load %arg5[%c0_5, %c17, %c0_6] : memref<2x18x144xbf16, #tpu.memory_space<vmem>>, vector<2x1x144xbf16>
    tpu.vector_store %arg5[%c0_5, %c17, %c0_6], %1 {strides = array<i32>} : memref<2x18x144xbf16, #tpu.memory_space<vmem>>, vector<2x1x144xbf16>,
    %c0_7 = arith.constant 0 : index
    %c0_8 = arith.constant 0 : index
    %c0_9 = arith.constant 0 : index
    %5 = vector.load %arg5[%c0_7, %c0_8, %c0_9] : memref<2x18x144xbf16, #tpu.memory_space<vmem>>, vector<2x18x8xbf16>
    tpu.vector_store %arg5[%c0_7, %c0_8, %c0_9], %2 {strides = array<i32>} : memref<2x18x144xbf16, #tpu.memory_space<vmem>>, vector<2x18x8xbf16>,
    %c0_10 = arith.constant 0 : index
    %c0_11 = arith.constant 0 : index
    %c136 = arith.constant 136 : index
    %6 = vector.load %arg5[%c0_10, %c0_11, %c136] : memref<2x18x144xbf16, #tpu.memory_space<vmem>>, vector<2x18x8xbf16>
    tpu.vector_store %arg5[%c0_10, %c0_11, %c136], %2 {strides = array<i32>} : memref<2x18x144xbf16, #tpu.memory_space<vmem>>, vector<2x18x8xbf16>,
    %7 = arith.truncf %0 : vector<32x128xf32> to vector<32x128xbf16>
    %8 = vector.shape_cast %7 : vector<32x128xbf16> to vector<2x16x128xbf16>
    %c0_12 = arith.constant 0 : index
    %c1 = arith.constant 1 : index
    %c8 = arith.constant 8 : index
    %9 = vector.load %arg5[%c0_12, %c1, %c8] : memref<2x18x144xbf16, #tpu.memory_space<vmem>>, vector<2x16x128xbf16>
    tpu.vector_store %arg5[%c0_12, %c1, %c8], %8 {strides = array<i32>} : memref<2x18x144xbf16, #tpu.memory_space<vmem>>, vector<2x16x128xbf16>,
    %cst_13 = arith.constant 0.000000e+00 : f32
    %10 = vector.broadcast %cst_13 : f32 to vector<32x128xf32>
    %c0_14 = arith.constant 0 : index
    %c0_15 = arith.constant 0 : index
    %c0_16 = arith.constant 0 : index
    %11 = vector.load %arg5[%c0_14, %c0_15, %c0_16] : memref<2x18x144xbf16, #tpu.memory_space<vmem>>, vector<2x16x144xbf16>
    %12 = vector.shape_cast %11 : vector<2x16x144xbf16> to vector<32x144xbf16>
    %c0_17 = arith.constant 0 : index
    %c0_18 = arith.constant 0 : index
    %c0_19 = arith.constant 0 : index
    %13 = vector.load %arg1[%c0_17, %c0_18, %c0_19] : memref<3x144x128xbf16, #tpu.memory_space<vmem>>, vector<1x144x128xbf16>
    %14 = vector.shape_cast %13 : vector<1x144x128xbf16> to vector<144x128xbf16>
    %cst_20 = arith.constant dense<0.000000e+00> : vector<32x128xf32>
    %15 = tpu.matmul %12, %14, %cst_20 {dimension_numbers = #tpu.dot_dimension_numbers<[1], [0], [0], [1], [0, 0, 1, 1], [], []>} : vector<32x144xbf16>, vector<144x128xbf16>, vector<32x128xf32> -> vector<32x128xf32>
    %16 = arith.addf %10, %15 : vector<32x128xf32>
    %c0_21 = arith.constant 0 : index
    %c1_22 = arith.constant 1 : index
    %c0_23 = arith.constant 0 : index
    %17 = vector.load %arg5[%c0_21, %c1_22, %c0_23] : memref<2x18x144xbf16, #tpu.memory_space<vmem>>, vector<2x16x144xbf16>
    %18 = vector.shape_cast %17 : vector<2x16x144xbf16> to vector<32x144xbf16>
    %c1_24 = arith.constant 1 : index
    %c0_25 = arith.constant 0 : index
    %c0_26 = arith.constant 0 : index
    %19 = vector.load %arg1[%c1_24, %c0_25, %c0_26] : memref<3x144x128xbf16, #tpu.memory_space<vmem>>, vector<1x144x128xbf16>
    %20 = vector.shape_cast %19 : vector<1x144x128xbf16> to vector<144x128xbf16>
    %cst_27 = arith.constant dense<0.000000e+00> : vector<32x128xf32>
    %21 = tpu.matmul %18, %20, %cst_27 {dimension_numbers = #tpu.dot_dimension_numbers<[1], [0], [0], [1], [0, 0, 1, 1], [], []>} : vector<32x144xbf16>, vector<144x128xbf16>, vector<32x128xf32> -> vector<32x128xf32>
    %22 = arith.addf %16, %21 : vector<32x128xf32>
    %c0_28 = arith.constant 0 : index
    %c2 = arith.constant 2 : index
    %c0_29 = arith.constant 0 : index
    %23 = vector.load %arg5[%c0_28, %c2, %c0_29] : memref<2x18x144xbf16, #tpu.memory_space<vmem>>, vector<2x16x144xbf16>
    %24 = vector.shape_cast %23 : vector<2x16x144xbf16> to vector<32x144xbf16>
    %c2_30 = arith.constant 2 : index
    %c0_31 = arith.constant 0 : index
    %c0_32 = arith.constant 0 : index
    %25 = vector.load %arg1[%c2_30, %c0_31, %c0_32] : memref<3x144x128xbf16, #tpu.memory_space<vmem>>, vector<1x144x128xbf16>
    %26 = vector.shape_cast %25 : vector<1x144x128xbf16> to vector<144x128xbf16>
    %cst_33 = arith.constant dense<0.000000e+00> : vector<32x128xf32>
    %27 = tpu.matmul %24, %26, %cst_33 {dimension_numbers = #tpu.dot_dimension_numbers<[1], [0], [0], [1], [0, 0, 1, 1], [], []>} : vector<32x144xbf16>, vector<144x128xbf16>, vector<32x128xf32> -> vector<32x128xf32>
    %28 = arith.addf %22, %27 : vector<32x128xf32>
    %c0_34 = arith.constant 0 : index
    %c0_35 = arith.constant 0 : index
    %29 = vector.load %arg3[%c0_34, %c0_35] : memref<8x8xf32, #tpu.memory_space<vmem>>, vector<1x8xf32>
    %c1_36 = arith.constant 1 : index
    %c0_37 = arith.constant 0 : index
    %30 = vector.load %arg3[%c1_36, %c0_37] : memref<8x8xf32, #tpu.memory_space<vmem>>, vector<1x8xf32>
    %cst_38 = arith.constant dense<0.000000e+00> : vector<128xf32>
    %31 = vector.multi_reduction <add>, %28, %cst_38 [0] : vector<32x128xf32> to vector<128xf32>
    %32 = vector.shape_cast %31 : vector<128xf32> to vector<1x128xf32>
    %33 = vector.extract_strided_slice %32 {offsets = [0, 0], sizes = [1, 8], strides = [1, 1]} : vector<1x128xf32> to vector<1x8xf32>
    %34 = vector.extract_strided_slice %32 {offsets = [0, 8], sizes = [1, 8], strides = [1, 1]} : vector<1x128xf32> to vector<1x8xf32>
    %35 = arith.addf %33, %34 : vector<1x8xf32>
    %36 = vector.extract_strided_slice %32 {offsets = [0, 16], sizes = [1, 8], strides = [1, 1]} : vector<1x128xf32> to vector<1x8xf32>
    %37 = arith.addf %35, %36 : vector<1x8xf32>
    %38 = vector.extract_strided_slice %32 {offsets = [0, 24], sizes = [1, 8], strides = [1, 1]} : vector<1x128xf32> to vector<1x8xf32>
    %39 = arith.addf %37, %38 : vector<1x8xf32>
    %40 = vector.extract_strided_slice %32 {offsets = [0, 32], sizes = [1, 8], strides = [1, 1]} : vector<1x128xf32> to vector<1x8xf32>
    %41 = arith.addf %39, %40 : vector<1x8xf32>
    %42 = vector.extract_strided_slice %32 {offsets = [0, 40], sizes = [1, 8], strides = [1, 1]} : vector<1x128xf32> to vector<1x8xf32>
    %43 = arith.addf %41, %42 : vector<1x8xf32>
    %44 = vector.extract_strided_slice %32 {offsets = [0, 48], sizes = [1, 8], strides = [1, 1]} : vector<1x128xf32> to vector<1x8xf32>
    %45 = arith.addf %43, %44 : vector<1x8xf32>
    %46 = vector.extract_strided_slice %32 {offsets = [0, 56], sizes = [1, 8], strides = [1, 1]} : vector<1x128xf32> to vector<1x8xf32>
    %47 = arith.addf %45, %46 : vector<1x8xf32>
    %48 = vector.extract_strided_slice %32 {offsets = [0, 64], sizes = [1, 8], strides = [1, 1]} : vector<1x128xf32> to vector<1x8xf32>
    %49 = arith.addf %47, %48 : vector<1x8xf32>
    %50 = vector.extract_strided_slice %32 {offsets = [0, 72], sizes = [1, 8], strides = [1, 1]} : vector<1x128xf32> to vector<1x8xf32>
    %51 = arith.addf %49, %50 : vector<1x8xf32>
    %52 = vector.extract_strided_slice %32 {offsets = [0, 80], sizes = [1, 8], strides = [1, 1]} : vector<1x128xf32> to vector<1x8xf32>
    %53 = arith.addf %51, %52 : vector<1x8xf32>
    %54 = vector.extract_strided_slice %32 {offsets = [0, 88], sizes = [1, 8], strides = [1, 1]} : vector<1x128xf32> to vector<1x8xf32>
    %55 = arith.addf %53, %54 : vector<1x8xf32>
    %56 = vector.extract_strided_slice %32 {offsets = [0, 96], sizes = [1, 8], strides = [1, 1]} : vector<1x128xf32> to vector<1x8xf32>
    %57 = arith.addf %55, %56 : vector<1x8xf32>
    %58 = vector.extract_strided_slice %32 {offsets = [0, 104], sizes = [1, 8], strides = [1, 1]} : vector<1x128xf32> to vector<1x8xf32>
    %59 = arith.addf %57, %58 : vector<1x8xf32>
    %60 = vector.extract_strided_slice %32 {offsets = [0, 112], sizes = [1, 8], strides = [1, 1]} : vector<1x128xf32> to vector<1x8xf32>
    %61 = arith.addf %59, %60 : vector<1x8xf32>
    %62 = vector.extract_strided_slice %32 {offsets = [0, 120], sizes = [1, 8], strides = [1, 1]} : vector<1x128xf32> to vector<1x8xf32>
    %63 = arith.addf %61, %62 : vector<1x8xf32>
    %cst_39 = arith.constant 0.001953125 : f32
    %64 = vector.broadcast %cst_39 : f32 to vector<1x8xf32>
    %65 = arith.mulf %63, %64 : vector<1x8xf32>
    %66 = tpu.concatenate %65, %65, %65, %65, %65, %65, %65, %65, %65, %65, %65, %65, %65, %65, %65, %65 in 1 : vector<1x8xf32>, vector<1x8xf32>, vector<1x8xf32>, vector<1x8xf32>, vector<1x8xf32>, vector<1x8xf32>, vector<1x8xf32>, vector<1x8xf32>, vector<1x8xf32>, vector<1x8xf32>, vector<1x8xf32>, vector<1x8xf32>, vector<1x8xf32>, vector<1x8xf32>, vector<1x8xf32>, vector<1x8xf32> -> vector<1x128xf32>
    %67 = vector.broadcast %66 : vector<1x128xf32> to vector<32x128xf32>
    %68 = arith.subf %28, %67 : vector<32x128xf32>
    %69 = arith.mulf %68, %68 : vector<32x128xf32>
    %cst_40 = arith.constant dense<0.000000e+00> : vector<128xf32>
    %70 = vector.multi_reduction <add>, %69, %cst_40 [0] : vector<32x128xf32> to vector<128xf32>
    %71 = vector.shape_cast %70 : vector<128xf32> to vector<1x128xf32>
    %72 = vector.extract_strided_slice %71 {offsets = [0, 0], sizes = [1, 8], strides = [1, 1]} : vector<1x128xf32> to vector<1x8xf32>
    %73 = vector.extract_strided_slice %71 {offsets = [0, 8], sizes = [1, 8], strides = [1, 1]} : vector<1x128xf32> to vector<1x8xf32>
    %74 = arith.addf %72, %73 : vector<1x8xf32>
    %75 = vector.extract_strided_slice %71 {offsets = [0, 16], sizes = [1, 8], strides = [1, 1]} : vector<1x128xf32> to vector<1x8xf32>
    %76 = arith.addf %74, %75 : vector<1x8xf32>
    %77 = vector.extract_strided_slice %71 {offsets = [0, 24], sizes = [1, 8], strides = [1, 1]} : vector<1x128xf32> to vector<1x8xf32>
    %78 = arith.addf %76, %77 : vector<1x8xf32>
    %79 = vector.extract_strided_slice %71 {offsets = [0, 32], sizes = [1, 8], strides = [1, 1]} : vector<1x128xf32> to vector<1x8xf32>
    %80 = arith.addf %78, %79 : vector<1x8xf32>
    %81 = vector.extract_strided_slice %71 {offsets = [0, 40], sizes = [1, 8], strides = [1, 1]} : vector<1x128xf32> to vector<1x8xf32>
    %82 = arith.addf %80, %81 : vector<1x8xf32>
    %83 = vector.extract_strided_slice %71 {offsets = [0, 48], sizes = [1, 8], strides = [1, 1]} : vector<1x128xf32> to vector<1x8xf32>
    %84 = arith.addf %82, %83 : vector<1x8xf32>
    %85 = vector.extract_strided_slice %71 {offsets = [0, 56], sizes = [1, 8], strides = [1, 1]} : vector<1x128xf32> to vector<1x8xf32>
    %86 = arith.addf %84, %85 : vector<1x8xf32>
    %87 = vector.extract_strided_slice %71 {offsets = [0, 64], sizes = [1, 8], strides = [1, 1]} : vector<1x128xf32> to vector<1x8xf32>
    %88 = arith.addf %86, %87 : vector<1x8xf32>
    %89 = vector.extract_strided_slice %71 {offsets = [0, 72], sizes = [1, 8], strides = [1, 1]} : vector<1x128xf32> to vector<1x8xf32>
    %90 = arith.addf %88, %89 : vector<1x8xf32>
    %91 = vector.extract_strided_slice %71 {offsets = [0, 80], sizes = [1, 8], strides = [1, 1]} : vector<1x128xf32> to vector<1x8xf32>
    %92 = arith.addf %90, %91 : vector<1x8xf32>
    %93 = vector.extract_strided_slice %71 {offsets = [0, 88], sizes = [1, 8], strides = [1, 1]} : vector<1x128xf32> to vector<1x8xf32>
    %94 = arith.addf %92, %93 : vector<1x8xf32>
    %95 = vector.extract_strided_slice %71 {offsets = [0, 96], sizes = [1, 8], strides = [1, 1]} : vector<1x128xf32> to vector<1x8xf32>
    %96 = arith.addf %94, %95 : vector<1x8xf32>
    %97 = vector.extract_strided_slice %71 {offsets = [0, 104], sizes = [1, 8], strides = [1, 1]} : vector<1x128xf32> to vector<1x8xf32>
    %98 = arith.addf %96, %97 : vector<1x8xf32>
    %99 = vector.extract_strided_slice %71 {offsets = [0, 112], sizes = [1, 8], strides = [1, 1]} : vector<1x128xf32> to vector<1x8xf32>
    %100 = arith.addf %98, %99 : vector<1x8xf32>
    %101 = vector.extract_strided_slice %71 {offsets = [0, 120], sizes = [1, 8], strides = [1, 1]} : vector<1x128xf32> to vector<1x8xf32>
    %102 = arith.addf %100, %101 : vector<1x8xf32>
    %cst_41 = arith.constant 0.001953125 : f32
    %103 = vector.broadcast %cst_41 : f32 to vector<1x8xf32>
    %104 = arith.mulf %102, %103 : vector<1x8xf32>
    %cst_42 = arith.constant 9.99999974E-6 : f32
    %105 = vector.broadcast %cst_42 : f32 to vector<1x8xf32>
    %106 = arith.addf %104, %105 : vector<1x8xf32>
    %107 = math.rsqrt %106 : vector<1x8xf32>
    %108 = arith.mulf %29, %107 : vector<1x8xf32>
    %109 = arith.mulf %65, %108 : vector<1x8xf32>
    %110 = arith.subf %30, %109 : vector<1x8xf32>
    %111 = tpu.concatenate %108, %108, %108, %108, %108, %108, %108, %108, %108, %108, %108, %108, %108, %108, %108, %108 in 1 : vector<1x8xf32>, vector<1x8xf32>, vector<1x8xf32>, vector<1x8xf32>, vector<1x8xf32>, vector<1x8xf32>, vector<1x8xf32>, vector<1x8xf32>, vector<1x8xf32>, vector<1x8xf32>, vector<1x8xf32>, vector<1x8xf32>, vector<1x8xf32>, vector<1x8xf32>, vector<1x8xf32>, vector<1x8xf32> -> vector<1x128xf32>
    %112 = vector.broadcast %111 : vector<1x128xf32> to vector<32x128xf32>
    %113 = arith.mulf %28, %112 : vector<32x128xf32>
    %114 = tpu.concatenate %110, %110, %110, %110, %110, %110, %110, %110, %110, %110, %110, %110, %110, %110, %110, %110 in 1 : vector<1x8xf32>, vector<1x8xf32>, vector<1x8xf32>, vector<1x8xf32>, vector<1x8xf32>, vector<1x8xf32>, vector<1x8xf32>, vector<1x8xf32>, vector<1x8xf32>, vector<1x8xf32>, vector<1x8xf32>, vector<1x8xf32>, vector<1x8xf32>, vector<1x8xf32>, vector<1x8xf32>, vector<1x8xf32> -> vector<1x128xf32>
    %115 = vector.broadcast %114 : vector<1x128xf32> to vector<32x128xf32>
    %116 = arith.addf %113, %115 : vector<32x128xf32>
    %c4 = arith.constant 4 : index
    %c0_43 = arith.constant 0 : index
    %117 = vector.load %arg3[%c4, %c0_43] : memref<8x8xf32, #tpu.memory_space<vmem>>, vector<1x8xf32>
    %118 = tpu.concatenate %117, %117, %117, %117, %117, %117, %117, %117, %117, %117, %117, %117, %117, %117, %117, %117 in 1 : vector<1x8xf32>, vector<1x8xf32>, vector<1x8xf32>, vector<1x8xf32>, vector<1x8xf32>, vector<1x8xf32>, vector<1x8xf32>, vector<1x8xf32>, vector<1x8xf32>, vector<1x8xf32>, vector<1x8xf32>, vector<1x8xf32>, vector<1x8xf32>, vector<1x8xf32>, vector<1x8xf32>, vector<1x8xf32> -> vector<1x128xf32>
    %cst_44 = arith.constant 0.000000e+00 : f32
    %119 = vector.broadcast %cst_44 : f32 to vector<32x128xf32>
    %120 = arith.cmpf oge, %116, %119 : vector<32x128xf32>
    %121 = vector.broadcast %118 : vector<1x128xf32> to vector<32x128xf32>
    %122 = arith.mulf %121, %116 : vector<32x128xf32>
    %123 = arith.select %120, %116, %122 : vector<32x128xi1>, vector<32x128xf32>
    %124 = arith.truncf %123 : vector<32x128xf32> to vector<32x128xbf16>
    %125 = vector.shape_cast %124 : vector<32x128xbf16> to vector<2x16x128xbf16>
    %c0_45 = arith.constant 0 : index
    %c1_46 = arith.constant 1 : index
    %c8_47 = arith.constant 8 : index
    %126 = vector.load %arg5[%c0_45, %c1_46, %c8_47] : memref<2x18x144xbf16, #tpu.memory_space<vmem>>, vector<2x16x128xbf16>
    tpu.vector_store %arg5[%c0_45, %c1_46, %c8_47], %125 {strides = array<i32>} : memref<2x18x144xbf16, #tpu.memory_space<vmem>>, vector<2x16x128xbf16>,
    %cst_48 = arith.constant 0.000000e+00 : f32
    %127 = vector.broadcast %cst_48 : f32 to vector<32x128xf32>
    %c0_49 = arith.constant 0 : index
    %c0_50 = arith.constant 0 : index
    %c0_51 = arith.constant 0 : index
    %128 = vector.load %arg5[%c0_49, %c0_50, %c0_51] : memref<2x18x144xbf16, #tpu.memory_space<vmem>>, vector<2x16x144xbf16>
    %129 = vector.shape_cast %128 : vector<2x16x144xbf16> to vector<32x144xbf16>
    %c0_52 = arith.constant 0 : index
    %c0_53 = arith.constant 0 : index
    %c0_54 = arith.constant 0 : index
    %130 = vector.load %arg2[%c0_52, %c0_53, %c0_54] : memref<3x144x128xbf16, #tpu.memory_space<vmem>>, vector<1x144x128xbf16>
    %131 = vector.shape_cast %130 : vector<1x144x128xbf16> to vector<144x128xbf16>
    %cst_55 = arith.constant dense<0.000000e+00> : vector<32x128xf32>
    %132 = tpu.matmul %129, %131, %cst_55 {dimension_numbers = #tpu.dot_dimension_numbers<[1], [0], [0], [1], [0, 0, 1, 1], [], []>} : vector<32x144xbf16>, vector<144x128xbf16>, vector<32x128xf32> -> vector<32x128xf32>
    %133 = arith.addf %127, %132 : vector<32x128xf32>
    %c0_56 = arith.constant 0 : index
    %c1_57 = arith.constant 1 : index
    %c0_58 = arith.constant 0 : index
    %134 = vector.load %arg5[%c0_56, %c1_57, %c0_58] : memref<2x18x144xbf16, #tpu.memory_space<vmem>>, vector<2x16x144xbf16>
    %135 = vector.shape_cast %134 : vector<2x16x144xbf16> to vector<32x144xbf16>
    %c1_59 = arith.constant 1 : index
    %c0_60 = arith.constant 0 : index
    %c0_61 = arith.constant 0 : index
    %136 = vector.load %arg2[%c1_59, %c0_60, %c0_61] : memref<3x144x128xbf16, #tpu.memory_space<vmem>>, vector<1x144x128xbf16>
    %137 = vector.shape_cast %136 : vector<1x144x128xbf16> to vector<144x128xbf16>
    %cst_62 = arith.constant dense<0.000000e+00> : vector<32x128xf32>
    %138 = tpu.matmul %135, %137, %cst_62 {dimension_numbers = #tpu.dot_dimension_numbers<[1], [0], [0], [1], [0, 0, 1, 1], [], []>} : vector<32x144xbf16>, vector<144x128xbf16>, vector<32x128xf32> -> vector<32x128xf32>
    %139 = arith.addf %133, %138 : vector<32x128xf32>
    %c0_63 = arith.constant 0 : index
    %c2_64 = arith.constant 2 : index
    %c0_65 = arith.constant 0 : index
    %140 = vector.load %arg5[%c0_63, %c2_64, %c0_65] : memref<2x18x144xbf16, #tpu.memory_space<vmem>>, vector<2x16x144xbf16>
    %141 = vector.shape_cast %140 : vector<2x16x144xbf16> to vector<32x144xbf16>
    %c2_66 = arith.constant 2 : index
    %c0_67 = arith.constant 0 : index
    %c0_68 = arith.constant 0 : index
    %142 = vector.load %arg2[%c2_66, %c0_67, %c0_68] : memref<3x144x128xbf16, #tpu.memory_space<vmem>>, vector<1x144x128xbf16>
    %143 = vector.shape_cast %142 : vector<1x144x128xbf16> to vector<144x128xbf16>
    %cst_69 = arith.constant dense<0.000000e+00> : vector<32x128xf32>
    %144 = tpu.matmul %141, %143, %cst_69 {dimension_numbers = #tpu.dot_dimension_numbers<[1], [0], [0], [1], [0, 0, 1, 1], [], []>} : vector<32x144xbf16>, vector<144x128xbf16>, vector<32x128xf32> -> vector<32x128xf32>
    %145 = arith.addf %139, %144 : vector<32x128xf32>
    %c2_70 = arith.constant 2 : index
    %c0_71 = arith.constant 0 : index
    %146 = vector.load %arg3[%c2_70, %c0_71] : memref<8x8xf32, #tpu.memory_space<vmem>>, vector<1x8xf32>
    %c3 = arith.constant 3 : index
    %c0_72 = arith.constant 0 : index
    %147 = vector.load %arg3[%c3, %c0_72] : memref<8x8xf32, #tpu.memory_space<vmem>>, vector<1x8xf32>
    %cst_73 = arith.constant dense<0.000000e+00> : vector<128xf32>
    %148 = vector.multi_reduction <add>, %145, %cst_73 [0] : vector<32x128xf32> to vector<128xf32>
    %149 = vector.shape_cast %148 : vector<128xf32> to vector<1x128xf32>
    %150 = vector.extract_strided_slice %149 {offsets = [0, 0], sizes = [1, 8], strides = [1, 1]} : vector<1x128xf32> to vector<1x8xf32>
    %151 = vector.extract_strided_slice %149 {offsets = [0, 8], sizes = [1, 8], strides = [1, 1]} : vector<1x128xf32> to vector<1x8xf32>
    %152 = arith.addf %150, %151 : vector<1x8xf32>
    %153 = vector.extract_strided_slice %149 {offsets = [0, 16], sizes = [1, 8], strides = [1, 1]} : vector<1x128xf32> to vector<1x8xf32>
    %154 = arith.addf %152, %153 : vector<1x8xf32>
    %155 = vector.extract_strided_slice %149 {offsets = [0, 24], sizes = [1, 8], strides = [1, 1]} : vector<1x128xf32> to vector<1x8xf32>
    %156 = arith.addf %154, %155 : vector<1x8xf32>
    %157 = vector.extract_strided_slice %149 {offsets = [0, 32], sizes = [1, 8], strides = [1, 1]} : vector<1x128xf32> to vector<1x8xf32>
    %158 = arith.addf %156, %157 : vector<1x8xf32>
    %159 = vector.extract_strided_slice %149 {offsets = [0, 40], sizes = [1, 8], strides = [1, 1]} : vector<1x128xf32> to vector<1x8xf32>
    %160 = arith.addf %158, %159 : vector<1x8xf32>
    %161 = vector.extract_strided_slice %149 {offsets = [0, 48], sizes = [1, 8], strides = [1, 1]} : vector<1x128xf32> to vector<1x8xf32>
    %162 = arith.addf %160, %161 : vector<1x8xf32>
    %163 = vector.extract_strided_slice %149 {offsets = [0, 56], sizes = [1, 8], strides = [1, 1]} : vector<1x128xf32> to vector<1x8xf32>
    %164 = arith.addf %162, %163 : vector<1x8xf32>
    %165 = vector.extract_strided_slice %149 {offsets = [0, 64], sizes = [1, 8], strides = [1, 1]} : vector<1x128xf32> to vector<1x8xf32>
    %166 = arith.addf %164, %165 : vector<1x8xf32>
    %167 = vector.extract_strided_slice %149 {offsets = [0, 72], sizes = [1, 8], strides = [1, 1]} : vector<1x128xf32> to vector<1x8xf32>
    %168 = arith.addf %166, %167 : vector<1x8xf32>
    %169 = vector.extract_strided_slice %149 {offsets = [0, 80], sizes = [1, 8], strides = [1, 1]} : vector<1x128xf32> to vector<1x8xf32>
    %170 = arith.addf %168, %169 : vector<1x8xf32>
    %171 = vector.extract_strided_slice %149 {offsets = [0, 88], sizes = [1, 8], strides = [1, 1]} : vector<1x128xf32> to vector<1x8xf32>
    %172 = arith.addf %170, %171 : vector<1x8xf32>
    %173 = vector.extract_strided_slice %149 {offsets = [0, 96], sizes = [1, 8], strides = [1, 1]} : vector<1x128xf32> to vector<1x8xf32>
    %174 = arith.addf %172, %173 : vector<1x8xf32>
    %175 = vector.extract_strided_slice %149 {offsets = [0, 104], sizes = [1, 8], strides = [1, 1]} : vector<1x128xf32> to vector<1x8xf32>
    %176 = arith.addf %174, %175 : vector<1x8xf32>
    %177 = vector.extract_strided_slice %149 {offsets = [0, 112], sizes = [1, 8], strides = [1, 1]} : vector<1x128xf32> to vector<1x8xf32>
    %178 = arith.addf %176, %177 : vector<1x8xf32>
    %179 = vector.extract_strided_slice %149 {offsets = [0, 120], sizes = [1, 8], strides = [1, 1]} : vector<1x128xf32> to vector<1x8xf32>
    %180 = arith.addf %178, %179 : vector<1x8xf32>
    %cst_74 = arith.constant 0.001953125 : f32
    %181 = vector.broadcast %cst_74 : f32 to vector<1x8xf32>
    %182 = arith.mulf %180, %181 : vector<1x8xf32>
    %183 = tpu.concatenate %182, %182, %182, %182, %182, %182, %182, %182, %182, %182, %182, %182, %182, %182, %182, %182 in 1 : vector<1x8xf32>, vector<1x8xf32>, vector<1x8xf32>, vector<1x8xf32>, vector<1x8xf32>, vector<1x8xf32>, vector<1x8xf32>, vector<1x8xf32>, vector<1x8xf32>, vector<1x8xf32>, vector<1x8xf32>, vector<1x8xf32>, vector<1x8xf32>, vector<1x8xf32>, vector<1x8xf32>, vector<1x8xf32> -> vector<1x128xf32>
    %184 = vector.broadcast %183 : vector<1x128xf32> to vector<32x128xf32>
    %185 = arith.subf %145, %184 : vector<32x128xf32>
    %186 = arith.mulf %185, %185 : vector<32x128xf32>
    %cst_75 = arith.constant dense<0.000000e+00> : vector<128xf32>
    %187 = vector.multi_reduction <add>, %186, %cst_75 [0] : vector<32x128xf32> to vector<128xf32>
    %188 = vector.shape_cast %187 : vector<128xf32> to vector<1x128xf32>
    %189 = vector.extract_strided_slice %188 {offsets = [0, 0], sizes = [1, 8], strides = [1, 1]} : vector<1x128xf32> to vector<1x8xf32>
    %190 = vector.extract_strided_slice %188 {offsets = [0, 8], sizes = [1, 8], strides = [1, 1]} : vector<1x128xf32> to vector<1x8xf32>
    %191 = arith.addf %189, %190 : vector<1x8xf32>
    %192 = vector.extract_strided_slice %188 {offsets = [0, 16], sizes = [1, 8], strides = [1, 1]} : vector<1x128xf32> to vector<1x8xf32>
    %193 = arith.addf %191, %192 : vector<1x8xf32>
    %194 = vector.extract_strided_slice %188 {offsets = [0, 24], sizes = [1, 8], strides = [1, 1]} : vector<1x128xf32> to vector<1x8xf32>
    %195 = arith.addf %193, %194 : vector<1x8xf32>
    %196 = vector.extract_strided_slice %188 {offsets = [0, 32], sizes = [1, 8], strides = [1, 1]} : vector<1x128xf32> to vector<1x8xf32>
    %197 = arith.addf %195, %196 : vector<1x8xf32>
    %198 = vector.extract_strided_slice %188 {offsets = [0, 40], sizes = [1, 8], strides = [1, 1]} : vector<1x128xf32> to vector<1x8xf32>
    %199 = arith.addf %197, %198 : vector<1x8xf32>
    %200 = vector.extract_strided_slice %188 {offsets = [0, 48], sizes = [1, 8], strides = [1, 1]} : vector<1x128xf32> to vector<1x8xf32>
    %201 = arith.addf %199, %200 : vector<1x8xf32>
    %202 = vector.extract_strided_slice %188 {offsets = [0, 56], sizes = [1, 8], strides = [1, 1]} : vector<1x128xf32> to vector<1x8xf32>
    %203 = arith.addf %201, %202 : vector<1x8xf32>
    %204 = vector.extract_strided_slice %188 {offsets = [0, 64], sizes = [1, 8], strides = [1, 1]} : vector<1x128xf32> to vector<1x8xf32>
    %205 = arith.addf %203, %204 : vector<1x8xf32>
    %206 = vector.extract_strided_slice %188 {offsets = [0, 72], sizes = [1, 8], strides = [1, 1]} : vector<1x128xf32> to vector<1x8xf32>
    %207 = arith.addf %205, %206 : vector<1x8xf32>
    %208 = vector.extract_strided_slice %188 {offsets = [0, 80], sizes = [1, 8], strides = [1, 1]} : vector<1x128xf32> to vector<1x8xf32>
    %209 = arith.addf %207, %208 : vector<1x8xf32>
    %210 = vector.extract_strided_slice %188 {offsets = [0, 88], sizes = [1, 8], strides = [1, 1]} : vector<1x128xf32> to vector<1x8xf32>
    %211 = arith.addf %209, %210 : vector<1x8xf32>
    %212 = vector.extract_strided_slice %188 {offsets = [0, 96], sizes = [1, 8], strides = [1, 1]} : vector<1x128xf32> to vector<1x8xf32>
    %213 = arith.addf %211, %212 : vector<1x8xf32>
    %214 = vector.extract_strided_slice %188 {offsets = [0, 104], sizes = [1, 8], strides = [1, 1]} : vector<1x128xf32> to vector<1x8xf32>
    %215 = arith.addf %213, %214 : vector<1x8xf32>
    %216 = vector.extract_strided_slice %188 {offsets = [0, 112], sizes = [1, 8], strides = [1, 1]} : vector<1x128xf32> to vector<1x8xf32>
    %217 = arith.addf %215, %216 : vector<1x8xf32>
    %218 = vector.extract_strided_slice %188 {offsets = [0, 120], sizes = [1, 8], strides = [1, 1]} : vector<1x128xf32> to vector<1x8xf32>
    %219 = arith.addf %217, %218 : vector<1x8xf32>
    %cst_76 = arith.constant 0.001953125 : f32
    %220 = vector.broadcast %cst_76 : f32 to vector<1x8xf32>
    %221 = arith.mulf %219, %220 : vector<1x8xf32>
    %cst_77 = arith.constant 9.99999974E-6 : f32
    %222 = vector.broadcast %cst_77 : f32 to vector<1x8xf32>
    %223 = arith.addf %221, %222 : vector<1x8xf32>
    %224 = math.rsqrt %223 : vector<1x8xf32>
    %225 = arith.mulf %146, %224 : vector<1x8xf32>
    %226 = arith.mulf %182, %225 : vector<1x8xf32>
    %227 = arith.subf %147, %226 : vector<1x8xf32>
    %228 = tpu.concatenate %225, %225, %225, %225, %225, %225, %225, %225, %225, %225, %225, %225, %225, %225, %225, %225 in 1 : vector<1x8xf32>, vector<1x8xf32>, vector<1x8xf32>, vector<1x8xf32>, vector<1x8xf32>, vector<1x8xf32>, vector<1x8xf32>, vector<1x8xf32>, vector<1x8xf32>, vector<1x8xf32>, vector<1x8xf32>, vector<1x8xf32>, vector<1x8xf32>, vector<1x8xf32>, vector<1x8xf32>, vector<1x8xf32> -> vector<1x128xf32>
    %229 = vector.broadcast %228 : vector<1x128xf32> to vector<32x128xf32>
    %230 = arith.mulf %145, %229 : vector<32x128xf32>
    %231 = tpu.concatenate %227, %227, %227, %227, %227, %227, %227, %227, %227, %227, %227, %227, %227, %227, %227, %227 in 1 : vector<1x8xf32>, vector<1x8xf32>, vector<1x8xf32>, vector<1x8xf32>, vector<1x8xf32>, vector<1x8xf32>, vector<1x8xf32>, vector<1x8xf32>, vector<1x8xf32>, vector<1x8xf32>, vector<1x8xf32>, vector<1x8xf32>, vector<1x8xf32>, vector<1x8xf32>, vector<1x8xf32>, vector<1x8xf32> -> vector<1x128xf32>
    %232 = vector.broadcast %231 : vector<1x128xf32> to vector<32x128xf32>
    %233 = arith.addf %230, %232 : vector<32x128xf32>
    %234 = arith.addf %233, %0 : vector<32x128xf32>
    %c0_78 = arith.constant 0 : index
    %c0_79 = arith.constant 0 : index
    %235 = vector.load %arg4[%c0_78, %c0_79] : memref<32x128xf32, #tpu.memory_space<vmem>>, vector<32x128xf32>
    tpu.vector_store %arg4[%c0_78, %c0_79], %234 {strides = array<i32>} : memref<32x128xf32, #tpu.memory_space<vmem>>, vector<32x128xf32>,
    return
  }
}

</mosaic_0001>

<bundles_post_ra>
// kernel: res_block_forward.1
= control target key start
LH: loop header
LB: loop body
LE: loop exit
PB: predicated region body
PF: predicated region fallthrough
CT: control target
= control target key end

     0   :  { %vm22_vm0 = vcmask 1040384   ;;  %vm23_vm1 = vsmask.f32 256  ;;  %vm25_vm2 = vcmask 126980   ;;  %vm26_vm4 = vsmask.f32 4352  ;;  %s3312_s0 = inlined_call_operand.vmem [shape: f32[32,128], index: 0, kind: input, shape index: {}]   ;;  %s3313_s1 = inlined_call_operand.vmem [shape: bf16[3,144,128], index: 1, kind: input, shape index: {}]   ;;  %s3314_s3 = inlined_call_operand.vmem [shape: f32[8,8], index: 3, kind: input, shape index: {}]   ;;  %s3315_s2 = inlined_call_operand.vmem [shape: bf16[3,144,128], index: 2, kind: input, shape index: {}]   ;;  %s3316_s4 = inlined_call_operand.vmem [shape: f32[32,128], index: 4, kind: output, shape index: {}]  }
   0x1   :  { %v18_v0 = vld [vmem:[%s3312_s0] sm:$0xff]  ;;  %v19_v1 = vld [vmem:[%s3312_s0 + $0x8] sm:$0xff]  ;;  %vm2498_vm3 = vmand %vm22_vm0, %vm23_vm1  ;;  %vm46_vm6 = vcmask 60416   ;;  %vm66_vm8 = vsmask.f32 4368  ;;  %v2449_v8 = vmov 0  }
   0x2   :  { %v62_v3 = vpack.c.bf16 %v18_v0, %v18_v0  ;;  %v63_v4 = vpack.c.bf16 %v19_v1, %v19_v1  ;;  %vm2504_vm5 = vmand %vm25_vm2, %vm26_vm4  ;;  %v29_v6 = vld [vmem:[#allocation2] sm:$0x11]  ;;  %v32_v7 = vld [vmem:[#allocation2 + $0x18] sm:$0x11]  ;;  %48 = vst.msk [vmem:[#allocation2 + $0x8] sm:$0xf] %vm46_vm6, %v2449_v8 }
   0x3   :  { %vm28_vm7 = vmor %vm2504_vm5, %vm2498_vm3  ;;  %v20_v9 = vld [vmem:[%s3312_s0 + $0x10] sm:$0xff]  ;;  %v21_v10 = vld [vmem:[%s3312_s0 + $0x18] sm:$0xff]  ;;  %vm54_vm9 = vcmask 126016   ;;  %52 = vst.msk [vmem:[#allocation2 + $0x20] sm:$0xf] %vm46_vm6, %v2449_v8  ;;  %vm133_vm10 = vcmask 1043520  }
   0x4   :  { %v69_v11 = vshrl.u32 %v62_v3, 16  ;;  %v72_v12 = vshll.u32 %v62_v3, 16  ;;  %v77_v13 = vshrl.u32 %v63_v4, 16  ;;  %v30_v14 = vsel %vm28_vm7, 0, %v29_v6  ;;  %56 = vst.msk [vmem:[#allocation2 + $0xc] sm:$0xf] %vm54_vm9, %v2449_v8  ;;  %vm2536_vm11 = vmor %vm23_vm1, %vm66_vm8 }
   0x5   :  { %v33_v15 = vsel %vm28_vm7, 0, %v32_v7  ;;  %v64_v16 = vpack.c.bf16 %v20_v9, %v20_v9  ;;  %v65_v17 = vpack.c.bf16 %v21_v10, %v21_v10  ;;  %v2364_v18 = vld [vmem:[%s3313_s1 + $0x38] sm:$0xff]  ;;  %v80_v21 = vshll.u32 %v63_v4, 16  ;;  %31 = vst [vmem:[#allocation2] sm:$0x11] %v30_v14  ;;  %v2363_v22 = vld [vmem:[%s3313_s1 + $0x30] sm:$0xff] }
   0x6   :  { %v71_v19 = vrot.slane %v69_v11, 7  ;;  %v79_v20 = vrot.slane %v77_v13, 7  ;;  %34 = vst [vmem:[#allocation2 + $0x18] sm:$0x11] %v33_v15  ;;  %445 = vmatpush.bf16.msra.mxu2 %v2364_v18  ;;  %v40_v29 = vld [vmem:[#allocation2 + $0x10] sm:$0x11] }
   0x7   :  { %v86_v23 = vshrl.u32 %v64_v16, 16  ;;  %v94_v24 = vshrl.u32 %v65_v17, 16  ;;  %v97_v25 = vshll.u32 %v65_v17, 16  ;;  %47 = vst.msk [vmem:[#allocation2] sm:$0xf] %vm46_vm6, %v2449_v8  ;;  %v89_v28 = vshll.u32 %v64_v16, 16 }
   0x8   :  { %v74_v26 = vor.u32 %v72_v12, %v71_v19  ;;  %v84_v27 = vrot.slane %v79_v20, 4  ;;  %51 = vst.msk [vmem:[#allocation2 + $0x18] sm:$0xf] %vm46_vm6, %v2449_v8  ;;  %vm35_vm12 = vsmask.f32 7938  ;;  %s2450_s27 = smov 8   ;;  %v82_v36 = vor.u32 %v80_v21, %v79_v20 }
   0x9   :  { %v88_v31 = vrot.slane %v86_v23, 7  ;;  %v96_v32 = vrot.slane %v94_v24, 7  ;;  %55 = vst.msk [vmem:[#allocation2 + $0x4] sm:$0xf] %vm54_vm9, %v2449_v8  ;;  %vm2546_vm13 = vmand %vm22_vm0, %vm35_vm12  ;;  %vm37_vm14 = vsmask.f32 7954 }
   0xa   :  { %102 = vrot.lane.b32.xlu0 %v74_v26, %s2450_s27  ;;  %106 = vrot.lane.b32.xlu1 %v84_v27, %s2450_s27  ;;  %v43_v34 = vld [vmem:[#allocation2 + $0x28] sm:$0x11]  ;;  %v75_v35 = vrot.slane %v71_v19, 4  ;;  %59 = vst.msk [vmem:[#allocation2 + $0x1c] sm:$0xf] %vm54_vm9, %v2449_v8  ;;  %vm38_vm15 = vmand %vm25_vm2, %vm37_vm14  ;;  %vm135_vm3 = vcmask 64516  }
   0xb   :  { %v92_v37 = vrot.slane %v88_v31, 4  ;;  %v99_v38 = vor.u32 %v97_v25, %v96_v32  ;;  %446 = vmatpush.bf16.msra.mxu2 %v2363_v22  ;;  %v2362_v39 = vld [vmem:[%s3313_s1 + $0x28] sm:$0xff]  ;;  %60 = vst.msk [vmem:[#allocation2 + $0x24] sm:$0xf] %vm54_vm9, %v2449_v8  ;;  %vm39_vm0 = vmor %vm38_vm15, %vm2546_vm13  ;;  %v91_v43 = vor.u32 %v89_v28, %v88_v31  ;;  %v101_v46 = vrot.slane %v96_v32, 4  ;;  %v2373_v47 = vld [vmem:[%s3313_s1 + $0x80] sm:$0xff] }
   0xc   :  { %v41_v41 = vsel %vm39_vm0, 0, %v40_v29  ;;  %v44_v42 = vsel %vm39_vm0, 0, %v43_v34  ;;  %vm134_vm5 = vmand %vm133_vm10, %vm35_vm12  ;;  %v83_v44 = vsel %vm2536_vm11, %v75_v35, %v82_v36  ;;  %v2361_v48 = vld [vmem:[%s3313_s1 + $0x20] sm:$0xff]  ;;  %329 = vmatpush.bf16.msra.mxu0 %v2373_v47  ;;  %vm49_vm7 = vcmask 57344   ;;  %v2372_v49 = vld [vmem:[%s3313_s1 + $0x78] sm:$0xff]  ;;  %s2452_s28 = smov 112  }
   0xd   :  { %v100_v40 = vsel %vm2536_vm11, %v92_v37, %v99_v38  ;;  %42 = vst [vmem:[#allocation2 + $0x10] sm:$0x11] %v41_v41  ;;  %vm136_vm2 = vmand %vm135_vm3, %vm37_vm14  ;;  %vm57_vm8 = vcmask 122944   ;;  %v2360_v50 = vld [vmem:[%s3313_s1 + $0x18] sm:$0xff]  ;;  %v2371_v51 = vld [vmem:[%s3313_s1 + $0x70] sm:$0xff]  ;;  %vm3329_vm9 = vcmask 64512  }
   0xe   :  { %110 = vrot.lane.b32.xlu2 %v100_v40, %s2450_s27  ;;  %45 = vst [vmem:[#allocation2 + $0x28] sm:$0x11] %v44_v42  ;;  %vm2570_vm6 = vmor %vm136_vm2, %vm134_vm5  ;;  %v2359_v52 = vld [vmem:[%s3313_s1 + $0x10] sm:$0xff]  ;;  %v2370_v54 = vld [vmem:[%s3313_s1 + $0x68] sm:$0xff]  ;;  %vm145_vm13 = vcmask 1040448   ;;  %vm147_vm14 = vcmask 61444  }
   0xf   :  { %447 = vmatpush.bf16.msra.mxu2 %v2362_v39  ;;  %50 = vst.msk [vmem:[#allocation2 + $0x10] sm:$0x1] %vm49_vm7, %v2449_v8  ;;  %v2358_v56 = vld [vmem:[%s3313_s1 + $0x8] sm:$0xff]  ;;  %v2369_v57 = vld [vmem:[%s3313_s1 + $0x60] sm:$0xff]  ;;  %vm2613_vm12 = vmor %vm135_vm3, %vm133_vm10  ;;  %vm3330_vm3 = vcmask 130048   ;;  %vm489_vm2 = vcmask 1042432  }
  0x10   :  { %58 = vst.msk [vmem:[#allocation2 + $0x14] sm:$0x1] %vm57_vm8, %v2449_v8  ;;  %330 = vmatpush.bf16.msra.mxu0 %v2372_v49  ;;  %v2365_v58 = vld [vmem:[%s3313_s1 + $0x40] sm:$0xff]  ;;  %v2368_v62 = vld [vmem:[%s3313_s1 + $0x58] sm:$0xff]  ;;  %vm146_vm10 = vmand %vm145_vm13, %vm23_vm1  ;;  %vm184_vm1 = vsmask.f32 3328 }
  0x11   :  { %53 = vst.msk [vmem:[#allocation2 + $0x28] sm:$0x1] %vm49_vm7, %v2449_v8  ;;  %v2357_v61 = vld [vmem:[%s3313_s1] sm:$0xff]  ;;  %471 = vmatpush.bf16.msra.mxu3 %v2365_v58  ;;  %vm148_vm15 = vmand %vm147_vm14, %vm26_vm4  ;;  %v2367_v2 = vld [vmem:[%s3313_s1 + $0x50] sm:$0xff]  ;;  %vm185_vm4 = vsmask.f32 7440 }
  0x12   :  { %104 = vrot.lane.b32.xlu0 %v83_v44, %s2450_s27  ;;  %108 = vrot.lane.b32.xlu1 %v91_v43, %s2450_s27  ;;  %61 = vst.msk [vmem:[#allocation2 + $0x2c] sm:$0x1] %vm57_vm8, %v2449_v8  ;;  %v2383_v3 = vld [vmem:[%s3313_s1 + $0xd0] sm:$0xff]  ;;  %vm2634_vm0 = vmor %vm148_vm15, %vm146_vm10  ;;  %v2374_v6 = vld [vmem:[%s3313_s1 + $0x88] sm:$0xff]  ;;  %vm490_vm7 = vcmask 1046532   ;;  %s2453_s29 = smov 120  }
  0x13   :  { %448 = vmatpush.bf16.msra.mxu2 %v2361_v48  ;;  %355 = vmatpush.bf16.msra.mxu1 %v2374_v6  ;;  %v2366_v8 = vld [vmem:[%s3313_s1 + $0x48] sm:$0xff]  ;;  %v138_v12 = vld [vmem:[#allocation2] sm:$0xff]  ;;  %v2380_v21 = vld [vmem:[%s3313_s1 + $0xb8] sm:$0xff]  ;;  %s2454_s30 = smov 80   ;;  %s2455_s5 = smov 88   ;;  %vm3321_vm13 = vcmask 195584  }
  0x14   :  { %331 = vmatpush.bf16.msra.mxu0 %v2371_v51  ;;  %v2382_v11 = vld [vmem:[%s3313_s1 + $0xc8] sm:$0xff]  ;;  %v2381_v16 = vld [vmem:[%s3313_s1 + $0xc0] sm:$0xff]  ;;  %v153_v25 = vld [vmem:[#allocation2 + $0x18] sm:$0xff]  ;;  %s2456_s6 = smov 96   ;;  %s2457_s7 = smov 56   ;;  %vm3319_vm14 = vcmask 261120  }
  0x15   :  { %625 = vmatpush.bf16.msrb.mxu3 %v2383_v3  ;;  %v2379_v27 = vld [vmem:[%s3313_s1 + $0xb0] sm:$0xff]  ;;  %v2378_v36 = vld [vmem:[%s3313_s1 + $0xa8] sm:$0xff]  ;;  %v2377_v40 = vld [vmem:[%s3313_s1 + $0xa0] sm:$0xff]  ;;  %s2458_s8 = smov 64   ;;  %s2459_s9 = smov 72   ;;  %vm3317_vm10 = vcmask 326656  }
  0x16   :  { %112 = vrot.lane.b32.xlu2 %v101_v46, %s2450_s27  ;;  %vm2689_vm5 = vmor %vm184_vm1, %vm185_vm4  ;;  %s2460_s10 = smov 32   ;;  %s2461_s11 = smov 40   ;;  %vm3318_vm15 = vcmask 392192   ;;  %vm3320_vm1 = vcmask 457728   ;;  %vm3328_vm4 = vcmask 523264   ;;  %v2394_v30 = vld [vmem:[%s3315_s2 + $0x30] sm:$0xff] }
  0x17   :  { %449 = vmatpush.bf16.msra.mxu2 %v2360_v50  ;;  %v150_v14 = vld [vmem:[#allocation2 + $0x10] sm:$0x11]  ;;  %599 = vmatpush.bf16.msrb.mxu1 %v2382_v11  ;;  %vm2713_vm8 = vmor %vm489_vm2, %vm490_vm7  ;;  %s2462_s12 = smov 48   ;;  %s2463_s13 = smov 16   ;;  %vm3327_vm2 = vcmask 588800   ;;  %vm3331_vm7 = vcmask 654336  }
  0x18   :  { %332 = vmatpush.bf16.msra.mxu0 %v2370_v54  ;;  %s2464_s14 = smov 24   ;;  %v2406_v45 = vld [vmem:[%s3315_s2 + $0x90] sm:$0xff] }
  0x19   :  { %v157_v0 = vld [vmem:[#allocation2 + $0x28] sm:$0x11] }
  0x1b   :  { %450 = vmatpush.bf16.msra.mxu2 %v2359_v52  ;;  %600 = vmatpush.bf16.msrb.mxu1 %v2381_v16 }
  0x1c   :  { %333 = vmatpush.bf16.msra.mxu0 %v2369_v57  ;;  %v2376_v57 = vld [vmem:[%s3313_s1 + $0x98] sm:$0xff] }
  0x1f   :  { %451 = vmatpush.bf16.msra.mxu2 %v2358_v56  ;;  %601 = vmatpush.bf16.msrb.mxu1 %v2380_v21 }
  0x20   :  { %334 = vmatpush.bf16.msra.mxu0 %v2368_v62 }
  0x23   :  { %452 = vmatpush.bf16.msra.mxu2 %v2357_v61  ;;  %602 = vmatpush.bf16.msrb.mxu1 %v2379_v27 }
  0x24   :  { %335 = vmatpush.bf16.msra.mxu0 %v2367_v2 }
  0x27   :  { %603 = vmatpush.bf16.msrb.mxu1 %v2378_v36 }
  0x28   :  { %336 = vmatpush.bf16.msra.mxu0 %v2366_v8 }
  0x2b   :  { %604 = vmatpush.bf16.msrb.mxu1 %v2377_v40 }
  0x2f   :  { %605 = vmatpush.bf16.msrb.mxu1 %v2376_v57 }
  0x68   :  { %v111_v53 = vpop.permute.xlu2 %110 }
  0x69   :  { %v118_v55 = vrot.slane %v111_v53, 4 }
  0x6b   :  { %v125_v60 = vsel %vm3329_vm9, %v118_v55, %v111_v53 }
  0x6c   :  { %156 = vst.msk [vmem:[#allocation2 + $0x20] sm:$0xff] %vm2613_vm12, %v125_v60 }
  0x70   :  { %v113_v63 = vpop.permute.xlu2 %112 }
  0x71   :  { %v119_v1 = vrot.slane %v113_v63, 4 }
  0x73   :  { %v126_v5 = vsel %vm3329_vm9, %v119_v1, %v113_v63  ;;  %v2683_v50 = vld [vmem:[#allocation2 + $0x20] sm:$0xff] }
  0x74   :  { %v158_v7 = vsel %vm2634_vm0, %v126_v5, %v157_v0  ;;  %v221_v55 = vshll.u32 %v2683_v50, 16  ;;  %v225_v56 = vshrl.u32 %v2683_v50, 16  ;;  %v2375_v5 = vld [vmem:[%s3313_s1 + $0x90] sm:$0xff]  ;;  %s2451_s1 = smov 104  }
  0x75   :  { %159 = vst [vmem:[#allocation2 + $0x28] sm:$0x11] %v158_v7  ;;  %606 = vmatpush.bf16.msrb.mxu1 %v2375_v5 }
  0x76   :  { %v223_v2 = vrot.slane %v221_v55, 5  ;;  %v227_v3 = vrot.slane %v225_v56, 4 }
  0x78   :  { %v228_v16 = vor.u32 %v227_v3, %v223_v2 }
  0x7c   :  { %v103_v9 = vpop.permute.xlu0 %102  ;;  %v107_v10 = vpop.permute.xlu1 %106 }
  0x7d   :  { %v114_v13 = vrot.slane %v103_v9, 4  ;;  %v116_v15 = vrot.slane %v107_v10, 4 }
  0x7f   :  { %v121_v17 = vsel %vm3329_vm9, %v114_v13, %v103_v9  ;;  %v123_v18 = vsel %vm3329_vm9, %v116_v15, %v107_v10  ;;  %v183_v13 = vld [vmem:[#allocation2 + $0x28] sm:$0x11] }
  0x80   :  { %v139_v19 = vsel %vm2570_vm6, %v121_v17, %v138_v12  ;;  %v151_v20 = vsel %vm2634_vm0, %v123_v18, %v150_v14  ;;  %v2356_v17 = vld [vmem:[#allocation2 + $0x1c] sm:$0xf0]  ;;  %v504_v55 = vrot.slane %v183_v13, 5 }
  0x81   :  { %140 = vst [vmem:[#allocation2] sm:$0xff] %v139_v19  ;;  %v188_v31 = vshrl.u32 %v139_v19, 16  ;;  %v191_v32 = vshll.u32 %v139_v19, 16  ;;  %v231_v19 = vshll.u32 %v183_v13, 16 }
  0x82   :  { %152 = vst [vmem:[#allocation2 + $0x10] sm:$0x11] %v151_v20 }
  0x83   :  { %v190_v34 = vrot.slane %v188_v31, 4  ;;  %v193_v35 = vrot.slane %v191_v32, 5  ;;  %v233_v27 = vrot.slane %v231_v19, 5 }
  0x84   :  { %v105_v22 = vpop.permute.xlu0 %104  ;;  %v109_v23 = vpop.permute.xlu1 %108 }
  0x85   :  { %v115_v24 = vrot.slane %v105_v22, 4  ;;  %v117_v26 = vrot.slane %v109_v23, 4  ;;  %v194_v44 = vor.u32 %v193_v35, %v190_v34 }
  0x87   :  { %v122_v28 = vsel %vm3329_vm9, %v115_v24, %v105_v22  ;;  %v124_v29 = vsel %vm3329_vm9, %v117_v26, %v109_v23  ;;  %v195_v58 = vrot.slane %v194_v44, 4  ;;  %v2085_v22 = vld [vmem:[#allocation2 + $0x20] sm:$0xf0]  ;;  %v229_v23 = vrot.slane %v228_v16, 4 }
  0x88   :  { %144 = vst.msk [vmem:[#allocation2 + $0x8] sm:$0xff] %vm2613_vm12, %v122_v28  ;;  %v154_v33 = vsel %vm2570_vm6, %v124_v29, %v153_v25  ;;  %v2075_v37 = vld [vmem:[#allocation2] sm:$0xf]  ;;  %v2353_v38 = vld [vmem:[#allocation2 + $0x4] sm:$0xf] }
  0x89   :  { %155 = vst [vmem:[#allocation2 + $0x18] sm:$0xff] %v154_v33  ;;  %v2674_v39 = vld [vmem:[#allocation2 + $0x10] sm:$0x11]  ;;  %v212_v61 = vshrl.u32 %v154_v33, 16  ;;  %v215_v62 = vshll.u32 %v154_v33, 16  ;;  %v234_v31 = vsel %vm2689_vm5, %v229_v23, %v233_v27 }
  0x8a   :  { %v207_v53 = vshll.u32 %v2674_v39, 16  ;;  %v497_v32 = vrot.slane %v2674_v39, 5  ;;  %v483_v34 = vld [vmem:[#allocation2] sm:$0xee] }
  0x8b   :  { %v214_v7 = vrot.slane %v212_v61, 4  ;;  %v217_v8 = vrot.slane %v215_v62, 5 }
  0x8c   :  { %v209_v1 = vrot.slane %v207_v53, 5 }
  0x8d   :  { %v218_v18 = vor.u32 %v217_v8, %v214_v7 }
  0x8f   :  { %v2354_v41 = vld [vmem:[#allocation2 + $0x4] sm:$0xf0]  ;;  %v2077_v42 = vld [vmem:[#allocation2 + $0x8] sm:$0xf0]  ;;  %v219_v26 = vrot.slane %v218_v18, 4 }
  0x90   :  { %v2679_v43 = vld [vmem:[#allocation2 + $0x8] sm:$0xff]  ;;  %v2076_v46 = vor.u32 %v2354_v41, %v2075_v37  ;;  %v2080_v47 = vor.u32 %v2353_v38, %v2077_v42  ;;  %v2083_v20 = vld [vmem:[#allocation2 + $0x18] sm:$0xf]  ;;  %v2355_v21 = vld [vmem:[#allocation2 + $0x1c] sm:$0xf]  ;;  %v260_v37 = vunpack.c.l.b16 %v234_v31  ;;  %v261_v38 = vunpack.c.h.b16 %v234_v31 }
  0x91   :  { %v197_v48 = vshll.u32 %v2679_v43, 16  ;;  %v201_v49 = vshrl.u32 %v2679_v43, 16  ;;  %v2084_v24 = vor.u32 %v2356_v17, %v2083_v20  ;;  %v2088_v25 = vor.u32 %v2355_v21, %v2085_v22 }
  0x92   :  { %453 = vmatmul.bf16.vlgmr.msra.gmra.mxu2 %v2076_v46  ;;  %2125 = vmatmul.msk.bf16.vlgmr.msra.gmra.mxu3 %vm3330_vm3, %v2080_v47  ;;  %v494_v28 = vrot.slane %v2679_v43, 5  ;;  %v224_v29 = vsel %vm2689_vm5, %v219_v26, %v223_v2  ;;  %v2127_v41 = vrot.slane %v483_v34, 9 }
  0x93   :  { %v199_v51 = vrot.slane %v197_v48, 5  ;;  %v203_v52 = vrot.slane %v201_v49, 4  ;;  %v258_v35 = vunpack.c.l.b16 %v224_v29  ;;  %v259_v36 = vunpack.c.h.b16 %v224_v29 }
  0x94   :  { %v496_v33 = vrot.slane %v494_v28, 4  ;;  %v495_v39 = vsel %vm2713_vm8, %v2127_v41, %v494_v28  ;;  %v501_v49 = vrot.slane %v2683_v50, 5 }
  0x95   :  { %v204_v60 = vor.u32 %v203_v52, %v199_v51  ;;  %v200_v63 = vsel %vm2689_vm5, %v195_v58, %v199_v51  ;;  %v264_v43 = vpack.c.b16 %v260_v37, %v258_v35  ;;  %v265_v44 = vpack.c.b16 %v261_v38, %v259_v36  ;;  %v484_v51 = vld [vmem:[#allocation2 + $0x18] sm:$0xee] }
  0x96   :  { %v254_v9 = vunpack.c.l.b16 %v200_v63  ;;  %v255_v10 = vunpack.c.h.b16 %v200_v63  ;;  %v498_v42 = vsel %vm2713_vm8, %v496_v33, %v497_v32  ;;  %v526_v47 = vunpack.c.h.b16 %v495_v39 }
  0x97   :  { %v205_v0 = vrot.slane %v204_v60, 4  ;;  %v528_v46 = vunpack.c.h.b16 %v498_v42  ;;  %v2128_v52 = vrot.slane %v484_v51, 9  ;;  %v503_v53 = vrot.slane %v501_v49, 4 }
  0x98   :  { %v527_v56 = vunpack.c.l.b16 %v498_v42  ;;  %v525_v57 = vunpack.c.l.b16 %v495_v39 }
  0x99   :  { %v210_v6 = vsel %vm2689_vm5, %v205_v0, %v209_v1  ;;  %v534_v48 = vpack.c.b16 %v528_v46, %v526_v47  ;;  %v502_v58 = vsel %vm2713_vm8, %v2128_v52, %v501_v49  ;;  %v505_v60 = vsel %vm2713_vm8, %v503_v53, %v504_v55 }
  0x9a   :  { %v256_v11 = vunpack.c.l.b16 %v210_v6  ;;  %v257_v12 = vunpack.c.h.b16 %v210_v6  ;;  %v533_v61 = vpack.c.b16 %v527_v56, %v525_v57  ;;  %v530_v62 = vunpack.c.h.b16 %v502_v58 }
  0x9b   :  { %v532_v63 = vunpack.c.h.b16 %v505_v60  ;;  %v529_v50 = vunpack.c.l.b16 %v502_v58  ;;  %v531_v1 = vunpack.c.l.b16 %v505_v60 }
  0x9c   :  { %v262_v14 = vpack.c.b16 %v256_v11, %v254_v9  ;;  %v263_v15 = vpack.c.b16 %v257_v12, %v255_v10 }
  0x9d   :  { %v536_v0 = vpack.c.b16 %v532_v63, %v530_v62  ;;  %v535_v2 = vpack.c.b16 %v531_v1, %v529_v50 }
  0x9e   :  { %337 = vmatmul.bf16.vlgmr.msra.gmra.mxu0 %v262_v14  ;;  %2071 = vmatmul.msk.bf16.vlgmr.msra.gmra.mxu1 %vm3330_vm3, %v263_v15 }
  0xa2   :  { %458 = vmatmul.bf16.gmra.mxu2 %v2084_v24  ;;  %2126 = vmatmul.msk.bf16.gmra.mxu3 %vm3330_vm3, %v2088_v25 }
  0xae   :  { %342 = vmatmul.bf16.gmra.mxu0 %v264_v43  ;;  %2072 = vmatmul.msk.bf16.gmra.mxu1 %vm3330_vm3, %v265_v44 }
  0xb2   :  { %2183 = vmatmul.msk.bf16.vlgmr.msrb.gmra.mxu3 %vm3330_vm3, %v534_v48 }
  0xbe   :  { %607 = vmatmul.bf16.vlgmr.msrb.gmra.mxu1 %v533_v61 }
  0xc2   :  { %2184 = vmatmul.msk.bf16.gmra.mxu3 %vm3330_vm3, %v536_v0 }
  0xce   :  { %612 = vmatmul.bf16.gmra.mxu1 %v535_v2 }
 0x115   :  { %v473_v3 = vpop.f32.mrf.mxu3  ;;  %v454_v12 = vpop.f32.mrf.mxu2 }
 0x11b   :  { %v357_v5 = vpop.f32.mrf.mxu1  ;;  %v338_v9 = vpop.f32.mrf.mxu0 }
 0x11c   :  { %v358_v23 = vadd.f32 %v357_v5, %v338_v9 }
 0x11d   :  { %v475_v6 = vpop.f32.mrf.mxu3  ;;  %v456_v16 = vpop.f32.mrf.mxu2 }
 0x11e   :  { %v455_v29 = vadd.f32 %v454_v12, %v358_v23 }
 0x120   :  { %v474_v41 = vadd.f32 %v473_v3, %v455_v29 }
 0x123   :  { %v359_v7 = vpop.f32.mrf.mxu1  ;;  %v340_v14 = vpop.f32.mrf.mxu0 }
 0x124   :  { %v360_v22 = vadd.f32 %v359_v7, %v340_v14 }
 0x125   :  { %v478_v8 = vpop.f32.mrf.mxu3  ;;  %v459_v21 = vpop.f32.mrf.mxu2 }
 0x126   :  { %v457_v27 = vadd.f32 %v456_v16, %v360_v22 }
 0x128   :  { %v476_v35 = vadd.f32 %v475_v6, %v457_v27 }
 0x12b   :  { %v362_v10 = vpop.f32.mrf.mxu1  ;;  %v343_v18 = vpop.f32.mrf.mxu0 }
 0x12c   :  { %v363_v24 = vadd.f32 %v362_v10, %v343_v18 }
 0x12d   :  { %v480_v11 = vpop.f32.mrf.mxu3  ;;  %v461_v37 = vpop.f32.mrf.mxu2 }
 0x12e   :  { %v460_v31 = vadd.f32 %v459_v21, %v363_v24 }
 0x130   :  { %v479_v43 = vadd.f32 %v478_v8, %v460_v31 }
 0x133   :  { %v364_v13 = vpop.f32.mrf.mxu1  ;;  %v345_v25 = vpop.f32.mrf.mxu0 }
 0x134   :  { %v365_v32 = vadd.f32 %v364_v13, %v345_v25 }
 0x135   :  { %v627_v15 = vpop.f32.mrf.mxu3 }
 0x136   :  { %v462_v38 = vadd.f32 %v461_v37, %v365_v32  ;;  %v2791_v32 = vld [vmem:[%s3314_s3 + $0x4] sm:$0x1] }
 0x138   :  { %v481_v49 = vadd.f32 %v480_v11, %v462_v38 }
 0x13b   :  { %v608_v17 = vpop.f32.mrf.mxu1 }
 0x13c   :  { %v628_v34 = vadd.f32 %v627_v15, %v608_v17 }
 0x13d   :  { %v629_v19 = vpop.f32.mrf.mxu3 }
 0x13e   :  { %v2731_v44 = vadd.f32 %v628_v34, %v474_v41 }
 0x143   :  { %v610_v20 = vpop.f32.mrf.mxu1 }
 0x144   :  { %v630_v33 = vadd.f32 %v629_v19, %v610_v20 }
 0x145   :  { %v632_v26 = vpop.f32.mrf.mxu3 }
 0x146   :  { %v2729_v42 = vadd.f32 %v630_v33, %v476_v35 }
 0x148   :  { %v643_v48 = vadd.f32 %v2729_v42, %v2731_v44 }
 0x14b   :  { %v613_v28 = vpop.f32.mrf.mxu1 }
 0x14c   :  { %v633_v36 = vadd.f32 %v632_v26, %v613_v28 }
 0x14d   :  { %v634_v46 = vpop.f32.mrf.mxu3 }
 0x14e   :  { %v2733_v39 = vadd.f32 %v633_v36, %v479_v43 }
 0x150   :  { %v644_v52 = vadd.f32 %v643_v48, %v2733_v39 }
 0x153   :  { %v615_v47 = vpop.f32.mrf.mxu1 }
 0x154   :  { %v635_v51 = vadd.f32 %v634_v46, %v615_v47 }
 0x156   :  { %v2738_v53 = vadd.f32 %v635_v51, %v481_v49 }
 0x158   :  { %v645_v55 = vadd.f32 %v644_v52, %v2738_v53 }
 0x15a   :  { %v646_v56 = vrot.slane %v645_v55, 4 }
 0x15c   :  { %v647_v57 = vadd.f32 %v646_v56, %v645_v55 }
 0x15e   :  { %v648_v58 = vrot.slane %v647_v57, 2 }
 0x160   :  { %v649_v60 = vadd.f32 %v648_v58, %v647_v57 }
 0x162   :  { %v650_v61 = vrot.slane %v649_v60, 1 }
 0x164   :  { %v651_v62 = vadd.f32 %v650_v61, %v649_v60 }
 0x166   :  { %661 = vrot.lane.b32.xlu2 %v651_v62, %s2451_s1  ;;  %657 = vrot.lane.b32.xlu1 %v651_v62, %s2452_s28 }
 0x167   :  { %653 = vrot.lane.b32.xlu0 %v651_v62, %s2453_s29 }
 0x16e   :  { %673 = vrot.lane.b32.xlu2 %v651_v62, %s2454_s30  ;;  %669 = vrot.lane.b32.xlu1 %v651_v62, %s2455_s5 }
 0x16f   :  { %665 = vrot.lane.b32.xlu0 %v651_v62, %s2456_s6 }
 0x176   :  { %685 = vrot.lane.b32.xlu2 %v651_v62, %s2457_s7  ;;  %681 = vrot.lane.b32.xlu1 %v651_v62, %s2458_s8 }
 0x177   :  { %677 = vrot.lane.b32.xlu0 %v651_v62, %s2459_s9 }
 0x17e   :  { %697 = vrot.lane.b32.xlu2 %v651_v62, %s2460_s10  ;;  %693 = vrot.lane.b32.xlu1 %v651_v62, %s2461_s11 }
 0x17f   :  { %689 = vrot.lane.b32.xlu0 %v651_v62, %s2462_s12 }
 0x186   :  { %709 = vrot.lane.b32.xlu2 %v651_v62, %s2450_s27  ;;  %705 = vrot.lane.b32.xlu1 %v651_v62, %s2463_s13 }
 0x187   :  { %701 = vrot.lane.b32.xlu0 %v651_v62, %s2464_s14 }
 0x1c0   :  { %v662_v63 = vpop.permute.xlu2 %661 }
 0x1c8   :  { %v674_v3 = vpop.permute.xlu2 %673 }
 0x1d0   :  { %v686_v12 = vpop.permute.xlu2 %685 }
 0x1d8   :  { %v658_v0 = vpop.permute.xlu1 %657  ;;  %v698_v20 = vpop.permute.xlu2 %697 }
 0x1d9   :  { %v654_v50 = vpop.permute.xlu0 %653 }
 0x1da   :  { %v656_v1 = vadd.f32 %v654_v50, %v651_v62 }
 0x1dc   :  { %v660_v2 = vadd.f32 %v658_v0, %v656_v1 }
 0x1de   :  { %v664_v6 = vadd.f32 %v662_v63, %v660_v2 }
 0x1e0   :  { %v670_v5 = vpop.permute.xlu1 %669  ;;  %v710_v27 = vpop.permute.xlu2 %709 }
 0x1e1   :  { %v666_v7 = vpop.permute.xlu0 %665 }
 0x1e2   :  { %v668_v8 = vadd.f32 %v666_v7, %v664_v6 }
 0x1e4   :  { %v672_v9 = vadd.f32 %v670_v5, %v668_v8 }
 0x1e6   :  { %v676_v11 = vadd.f32 %v674_v3, %v672_v9 }
 0x1e8   :  { %v682_v10 = vpop.permute.xlu1 %681 }
 0x1e9   :  { %v678_v13 = vpop.permute.xlu0 %677 }
 0x1ea   :  { %v680_v14 = vadd.f32 %v678_v13, %v676_v11 }
 0x1ec   :  { %v684_v15 = vadd.f32 %v682_v10, %v680_v14 }
 0x1ee   :  { %v688_v16 = vadd.f32 %v686_v12, %v684_v15 }
 0x1f0   :  { %v694_v17 = vpop.permute.xlu1 %693 }
 0x1f1   :  { %v690_v18 = vpop.permute.xlu0 %689 }
 0x1f2   :  { %v692_v19 = vadd.f32 %v690_v18, %v688_v16 }
 0x1f4   :  { %v696_v21 = vadd.f32 %v694_v17, %v692_v19 }
 0x1f6   :  { %v700_v22 = vadd.f32 %v698_v20, %v696_v21 }
 0x1f8   :  { %v706_v25 = vpop.permute.xlu1 %705 }
 0x1f9   :  { %v702_v23 = vpop.permute.xlu0 %701 }
 0x1fa   :  { %v704_v24 = vadd.f32 %v702_v23, %v700_v22 }
 0x1fc   :  { %v708_v26 = vadd.f32 %v706_v25, %v704_v24 }
 0x1fe   :  { %v712_v28 = vadd.f32 %v710_v27, %v708_v26 }
 0x200   :  { %v2756_v29 = vmul.f32 0.001953125, %v712_v28 }
 0x202   :  { %721 = vrot.lane.b32.xlu2 %v2756_v29, %s2464_s14  ;;  %718 = vrot.lane.b32.xlu1 %v2756_v29, %s2463_s13 }
 0x203   :  { %715 = vrot.lane.b32.xlu0 %v2756_v29, %s2450_s27 }
 0x20a   :  { %730 = vrot.lane.b32.xlu2 %v2756_v29, %s2462_s12  ;;  %727 = vrot.lane.b32.xlu1 %v2756_v29, %s2461_s11 }
 0x20b   :  { %724 = vrot.lane.b32.xlu0 %v2756_v29, %s2460_s10 }
 0x212   :  { %739 = vrot.lane.b32.xlu2 %v2756_v29, %s2459_s9  ;;  %736 = vrot.lane.b32.xlu1 %v2756_v29, %s2458_s8 }
 0x213   :  { %733 = vrot.lane.b32.xlu0 %v2756_v29, %s2457_s7 }
 0x21a   :  { %748 = vrot.lane.b32.xlu2 %v2756_v29, %s2456_s6  ;;  %745 = vrot.lane.b32.xlu1 %v2756_v29, %s2455_s5 }
 0x21b   :  { %742 = vrot.lane.b32.xlu0 %v2756_v29, %s2454_s30 }
 0x222   :  { %757 = vrot.lane.b32.xlu2 %v2756_v29, %s2453_s29  ;;  %754 = vrot.lane.b32.xlu1 %v2756_v29, %s2452_s28 }
 0x223   :  { %751 = vrot.lane.b32.xlu0 %v2756_v29, %s2451_s1 }
 0x22a   :  { %1017 = vrot.lane.b32.xlu2 %v2791_v32, %s2450_s27 }
 0x232   :  { %1020 = vrot.lane.b32.xlu2 %v2791_v32, %s2463_s13 }
 0x23a   :  { %1023 = vrot.lane.b32.xlu2 %v2791_v32, %s2464_s14 }
 0x242   :  { %1026 = vrot.lane.b32.xlu2 %v2791_v32, %s2460_s10 }
 0x25c   :  { %v722_v31 = vpop.permute.xlu2 %721 }
 0x264   :  { %v731_v35 = vpop.permute.xlu2 %730 }
 0x26c   :  { %v740_v47 = vpop.permute.xlu2 %739 }
 0x274   :  { %v719_v33 = vpop.permute.xlu1 %718  ;;  %v749_v58 = vpop.permute.xlu2 %748 }
 0x275   :  { %v716_v34 = vpop.permute.xlu0 %715 }
 0x276   :  { %v761_v36 = vsel %vm3329_vm9, %v2756_v29, %v716_v34 }
 0x277   :  { %v762_v38 = vsel %vm3330_vm3, %v761_v36, %v719_v33 }
 0x278   :  { %v764_v43 = vsel %vm3321_vm13, %v762_v38, %v722_v31  ;;  %vm3322_vm13 = vcmask 982016  }
 0x27c   :  { %v728_v37 = vpop.permute.xlu1 %727  ;;  %v758_v3 = vpop.permute.xlu2 %757 }
 0x27d   :  { %v725_v41 = vpop.permute.xlu0 %724 }
 0x27e   :  { %v766_v46 = vsel %vm3319_vm14, %v764_v43, %v725_v41  ;;  %vm3324_vm14 = vcmask 850944  }
 0x27f   :  { %v768_v48 = vsel %vm3317_vm10, %v766_v46, %v728_v37  ;;  %vm3326_vm10 = vcmask 719872  }
 0x280   :  { %v770_v52 = vsel %vm3318_vm15, %v768_v48, %v731_v35  ;;  %vm3325_vm15 = vcmask 785408  }
 0x284   :  { %v737_v49 = vpop.permute.xlu1 %736  ;;  %v1018_v25 = vpop.permute.xlu2 %1017 }
 0x285   :  { %v734_v51 = vpop.permute.xlu0 %733  ;;  %v1062_v26 = vsel %vm3329_vm9, %v2791_v32, %v1018_v25  ;;  %v642_v25 = vld [vmem:[%s3314_s3 + $0x1] sm:$0x1] }
 0x286   :  { %v772_v55 = vsel %vm3320_vm1, %v770_v52, %v734_v51  ;;  %vm3323_vm1 = vcmask 916480  }
 0x287   :  { %v774_v56 = vsel %vm3328_vm4, %v772_v55, %v737_v49 }
 0x288   :  { %v776_v61 = vsel %vm3327_vm2, %v774_v56, %v740_v47 }
 0x28c   :  { %v746_v57 = vpop.permute.xlu1 %745  ;;  %v1021_v27 = vpop.permute.xlu2 %1020 }
 0x28d   :  { %v743_v60 = vpop.permute.xlu0 %742  ;;  %v1063_v28 = vsel %vm3330_vm3, %v1062_v26, %v1021_v27 }
 0x28e   :  { %v778_v62 = vsel %vm3331_vm7, %v776_v61, %v743_v60 }
 0x28f   :  { %v780_v63 = vsel %vm3326_vm10, %v778_v62, %v746_v57  ;;  %vm3357_vm10 = vcmask 457728  }
 0x290   :  { %v782_v50 = vsel %vm3325_vm15, %v780_v63, %v749_v58  ;;  %vm3356_vm15 = vcmask 392192  }
 0x294   :  { %v755_v0 = vpop.permute.xlu1 %754  ;;  %v1024_v31 = vpop.permute.xlu2 %1023 }
 0x295   :  { %v752_v1 = vpop.permute.xlu0 %751 }
 0x296   :  { %v784_v2 = vsel %vm3324_vm14, %v782_v50, %v752_v1 }
 0x297   :  { %v786_v5 = vsel %vm3323_vm1, %v784_v2, %v755_v0  ;;  %vm3351_vm1 = vcmask 261120  }
 0x298   :  { %v788_v6 = vsel %vm3322_vm13, %v786_v5, %v758_v3  ;;  %vm3350_vm13 = vcmask 195584  }
 0x299   :  { %v789_v7 = vperm.slane %v788_v6, 0  ;;  %v1064_v33 = vsel %vm3350_vm13, %v1063_v28, %v1024_v31  ;;  %vm3352_vm13 = vcmask 326656  }
 0x29b   :  { %v790_v8 = vsub.f32 %v2731_v44, %v789_v7  ;;  %v791_v9 = vsub.f32 %v2729_v42, %v789_v7  ;;  %v792_v10 = vsub.f32 %v2733_v39, %v789_v7  ;;  %v793_v11 = vsub.f32 %v2738_v53, %v789_v7 }
 0x29c   :  { %v1027_v34 = vpop.permute.xlu2 %1026 }
 0x29d   :  { %v794_v12 = vmul.f32 %v790_v8, %v790_v8  ;;  %v795_v13 = vmul.f32 %v791_v9, %v791_v9  ;;  %v796_v14 = vmul.f32 %v792_v10, %v792_v10  ;;  %v797_v16 = vmul.f32 %v793_v11, %v793_v11 }
 0x29e   :  { %v1065_v35 = vsel %vm3351_vm1, %v1064_v33, %v1027_v34 }
 0x29f   :  { %v798_v15 = vadd.f32 %v795_v13, %v794_v12 }
 0x2a1   :  { %v799_v17 = vadd.f32 %v798_v15, %v796_v14 }
 0x2a3   :  { %v800_v18 = vadd.f32 %v799_v17, %v797_v16 }
 0x2a5   :  { %v801_v19 = vrot.slane %v800_v18, 4 }
 0x2a7   :  { %v802_v20 = vadd.f32 %v801_v19, %v800_v18 }
 0x2a9   :  { %v803_v21 = vrot.slane %v802_v20, 2 }
 0x2ab   :  { %v804_v22 = vadd.f32 %v803_v21, %v802_v20  ;;  %v641_v20 = vld [vmem:[%s3314_s3] sm:$0x1] }
 0x2ad   :  { %v805_v23 = vrot.slane %v804_v22, 1 }
 0x2af   :  { %v806_v24 = vadd.f32 %v805_v23, %v804_v22 }
 0x2b1   :  { %816 = vrot.lane.b32.xlu2 %v806_v24, %s2451_s1  ;;  %812 = vrot.lane.b32.xlu1 %v806_v24, %s2452_s28 }
 0x2b2   :  { %808 = vrot.lane.b32.xlu0 %v806_v24, %s2453_s29 }
 0x2b9   :  { %828 = vrot.lane.b32.xlu2 %v806_v24, %s2454_s30  ;;  %824 = vrot.lane.b32.xlu1 %v806_v24, %s2455_s5 }
 0x2ba   :  { %820 = vrot.lane.b32.xlu0 %v806_v24, %s2456_s6 }
 0x2c1   :  { %840 = vrot.lane.b32.xlu2 %v806_v24, %s2457_s7  ;;  %836 = vrot.lane.b32.xlu1 %v806_v24, %s2458_s8 }
 0x2c2   :  { %832 = vrot.lane.b32.xlu0 %v806_v24, %s2459_s9 }
 0x2c9   :  { %852 = vrot.lane.b32.xlu2 %v806_v24, %s2460_s10  ;;  %848 = vrot.lane.b32.xlu1 %v806_v24, %s2461_s11 }
 0x2ca   :  { %844 = vrot.lane.b32.xlu0 %v806_v24, %s2462_s12 }
 0x2d1   :  { %864 = vrot.lane.b32.xlu2 %v806_v24, %s2450_s27  ;;  %860 = vrot.lane.b32.xlu1 %v806_v24, %s2463_s13 }
 0x2d2   :  { %856 = vrot.lane.b32.xlu0 %v806_v24, %s2464_s14 }
 0x2d9   :  { %1029 = vrot.lane.b32.xlu2 %v2791_v32, %s2461_s11  ;;  %1050 = vrot.lane.b32.xlu1 %v2791_v32, %s2456_s6 }
 0x2e1   :  { %1032 = vrot.lane.b32.xlu2 %v2791_v32, %s2462_s12 }
 0x2e9   :  { %1035 = vrot.lane.b32.xlu2 %v2791_v32, %s2457_s7 }
 0x2f1   :  { %1038 = vrot.lane.b32.xlu2 %v2791_v32, %s2458_s8 }
 0x2f9   :  { %1041 = vrot.lane.b32.xlu2 %v2791_v32, %s2459_s9 }
 0x301   :  { %1044 = vrot.lane.b32.xlu2 %v2791_v32, %s2454_s30 }
 0x309   :  { %1047 = vrot.lane.b32.xlu2 %v2791_v32, %s2455_s5 }
 0x30b   :  { %v817_v36 = vpop.permute.xlu2 %816 }
 0x313   :  { %v829_v37 = vpop.permute.xlu2 %828 }
 0x31b   :  { %v841_v38 = vpop.permute.xlu2 %840 }
 0x323   :  { %v853_v41 = vpop.permute.xlu2 %852  ;;  %v813_v43 = vpop.permute.xlu1 %812 }
 0x324   :  { %v809_v46 = vpop.permute.xlu0 %808 }
 0x325   :  { %v811_v47 = vadd.f32 %v809_v46, %v806_v24 }
 0x327   :  { %v815_v48 = vadd.f32 %v813_v43, %v811_v47 }
 0x329   :  { %v819_v52 = vadd.f32 %v817_v36, %v815_v48 }
 0x32b   :  { %v865_v49 = vpop.permute.xlu2 %864  ;;  %v825_v51 = vpop.permute.xlu1 %824 }
 0x32c   :  { %v821_v55 = vpop.permute.xlu0 %820 }
 0x32d   :  { %v823_v56 = vadd.f32 %v821_v55, %v819_v52 }
 0x32f   :  { %v827_v57 = vadd.f32 %v825_v51, %v823_v56 }
 0x331   :  { %v831_v61 = vadd.f32 %v829_v37, %v827_v57 }
 0x333   :  { %v1030_v58 = vpop.permute.xlu2 %1029  ;;  %v837_v60 = vpop.permute.xlu1 %836 }
 0x334   :  { %v2858_v62 = vsel %vm3352_vm13, %v1065_v35, %v1030_v58  ;;  %v833_v63 = vpop.permute.xlu0 %832 }
 0x335   :  { %v835_v0 = vadd.f32 %v833_v63, %v831_v61 }
 0x337   :  { %v839_v50 = vadd.f32 %v837_v60, %v835_v0 }
 0x339   :  { %v843_v1 = vadd.f32 %v841_v38, %v839_v50 }
 0x33b   :  { %v849_v2 = vpop.permute.xlu1 %848 }
 0x33c   :  { %v845_v3 = vpop.permute.xlu0 %844 }
 0x33d   :  { %v847_v5 = vadd.f32 %v845_v3, %v843_v1 }
 0x33f   :  { %v851_v6 = vadd.f32 %v849_v2, %v847_v5 }
 0x341   :  { %v855_v7 = vadd.f32 %v853_v41, %v851_v6 }
 0x343   :  { %v861_v10 = vpop.permute.xlu1 %860 }
 0x344   :  { %v857_v8 = vpop.permute.xlu0 %856 }
 0x345   :  { %v859_v9 = vadd.f32 %v857_v8, %v855_v7 }
 0x347   :  { %v863_v11 = vadd.f32 %v861_v10, %v859_v9 }
 0x349   :  { %v867_v12 = vadd.f32 %v865_v49, %v863_v11 }
 0x34b   :  { %v868_v13 = vmul.f32 0.001953125, %v867_v12  ;;  %v2928_v34 = vpop.permute.xlu1 %1050 }
 0x34d   :  { %v869_v14 = vadd.f32 1e-05, %v868_v13 }
 0x34f   :  { %2440 = vrsqrt.f32 %v869_v14  ;;  %vm876_vm13 = vweird.f32 %v869_v14 }
 0x355   :  { %v2441_v15 = vpop.eup %2440 }
 0x356   :  { %v871_v16 = vmul.f32 %v2441_v15, %v869_v14  ;;  %vm877_vm1 = vweird.f32 %v2441_v15 }
 0x357   :  { %vm878_vm14 = vmor %vm876_vm13, %vm877_vm1  ;;  %vm3354_vm1 = vcmask 261120   ;;  %vm3355_vm13 = vcmask 326656  }
 0x358   :  { %v872_v17 = vmul.f32 %v2441_v15, %v871_v16 }
 0x35a   :  { %v873_v18 = vmul.f32 0.5, %v872_v17 }
 0x35c   :  { %v874_v19 = vsub.f32 1.5, %v873_v18 }
 0x35e   :  { %v875_v21 = vmul.f32 %v2441_v15, %v874_v19 }
 0x360   :  { %v879_v22 = vsel %vm878_vm14, %v2441_v15, %v875_v21  ;;  %vm3353_vm14 = vcmask 195584  }
 0x361   :  { %v880_v23 = vmul.f32 %v879_v22, %v641_v20 }
 0x363   :  { %890 = vrot.lane.b32.xlu2 %v880_v23, %s2464_s14  ;;  %887 = vrot.lane.b32.xlu1 %v880_v23, %s2463_s13  ;;  %v881_v24 = vmul.f32 %v880_v23, %v2756_v29  ;;  %v2898_v29 = vpop.permute.xlu2 %1032 }
 0x364   :  { %884 = vrot.lane.b32.xlu0 %v880_v23, %s2450_s27 }
 0x365   :  { %v2870_v26 = vsub.f32 %v642_v25, %v881_v24 }
 0x36b   :  { %893 = vrot.lane.b32.xlu1 %v880_v23, %s2460_s10  ;;  %953 = vrot.lane.b32.xlu2 %v2870_v26, %s2463_s13  ;;  %v2905_v27 = vpop.permute.xlu2 %1035 }
 0x36c   :  { %896 = vrot.lane.b32.xlu0 %v880_v23, %s2461_s11 }
 0x373   :  { %956 = vrot.lane.b32.xlu1 %v2870_v26, %s2464_s14  ;;  %992 = vrot.lane.b32.xlu2 %v2870_v26, %s2453_s29  ;;  %v2911_v28 = vpop.permute.xlu2 %1038 }
 0x374   :  { %899 = vrot.lane.b32.xlu0 %v880_v23, %s2462_s12 }
 0x37b   :  { %959 = vrot.lane.b32.xlu1 %v2870_v26, %s2460_s10  ;;  %1059 = vrot.lane.b32.xlu2 %v2791_v32, %s2453_s29  ;;  %v2916_v31 = vpop.permute.xlu2 %1041 }
 0x37c   :  { %902 = vrot.lane.b32.xlu0 %v880_v23, %s2457_s7 }
 0x383   :  { %962 = vrot.lane.b32.xlu1 %v2870_v26, %s2461_s11  ;;  %v2922_v33 = vpop.permute.xlu2 %1044 }
 0x384   :  { %905 = vrot.lane.b32.xlu0 %v880_v23, %s2458_s8 }
 0x38b   :  { %965 = vrot.lane.b32.xlu1 %v2870_v26, %s2462_s12  ;;  %v2930_v35 = vpop.permute.xlu2 %1047 }
 0x38c   :  { %908 = vrot.lane.b32.xlu0 %v880_v23, %s2459_s9 }
 0x393   :  { %968 = vrot.lane.b32.xlu1 %v2870_v26, %s2457_s7 }
 0x394   :  { %911 = vrot.lane.b32.xlu0 %v880_v23, %s2454_s30 }
 0x39b   :  { %971 = vrot.lane.b32.xlu1 %v2870_v26, %s2458_s8 }
 0x39c   :  { %914 = vrot.lane.b32.xlu0 %v880_v23, %s2455_s5 }
 0x3a3   :  { %974 = vrot.lane.b32.xlu1 %v2870_v26, %s2459_s9 }
 0x3a4   :  { %917 = vrot.lane.b32.xlu0 %v880_v23, %s2456_s6 }
 0x3ab   :  { %977 = vrot.lane.b32.xlu1 %v2870_v26, %s2454_s30 }
 0x3ac   :  { %920 = vrot.lane.b32.xlu0 %v880_v23, %s2451_s1 }
 0x3b3   :  { %980 = vrot.lane.b32.xlu1 %v2870_v26, %s2455_s5 }
 0x3b4   :  { %923 = vrot.lane.b32.xlu0 %v880_v23, %s2452_s28 }
 0x3bb   :  { %983 = vrot.lane.b32.xlu1 %v2870_v26, %s2456_s6 }
 0x3bc   :  { %926 = vrot.lane.b32.xlu0 %v880_v23, %s2453_s29 }
 0x3bd   :  { %v891_v43 = vpop.permute.xlu2 %890 }
 0x3c3   :  { %986 = vrot.lane.b32.xlu1 %v2870_v26, %s2451_s1 }
 0x3c4   :  { %950 = vrot.lane.b32.xlu0 %v2870_v26, %s2450_s27 }
 0x3c5   :  { %v954_v15 = vpop.permute.xlu2 %953 }
 0x3cb   :  { %1056 = vrot.lane.b32.xlu1 %v2791_v32, %s2452_s28 }
 0x3cc   :  { %989 = vrot.lane.b32.xlu0 %v2870_v26, %s2452_s28 }
 0x3d4   :  { %1053 = vrot.lane.b32.xlu0 %v2791_v32, %s2451_s1 }
 0x3d5   :  { %v888_v36 = vpop.permute.xlu1 %887 }
 0x3d6   :  { %v885_v37 = vpop.permute.xlu0 %884 }
 0x3d7   :  { %v929_v38 = vsel %vm3329_vm9, %v880_v23, %v885_v37 }
 0x3d8   :  { %v930_v41 = vsel %vm3330_vm3, %v929_v38, %v888_v36 }
 0x3d9   :  { %v931_v47 = vsel %vm3353_vm14, %v930_v41, %v891_v43 }
 0x3dd   :  { %v894_v46 = vpop.permute.xlu1 %893 }
 0x3de   :  { %v932_v48 = vsel %vm3354_vm1, %v931_v47, %v894_v46  ;;  %v897_v49 = vpop.permute.xlu0 %896 }
 0x3df   :  { %v933_v51 = vsel %vm3355_vm13, %v932_v48, %v897_v49 }
 0x3e5   :  { %v957_v52 = vpop.permute.xlu1 %956 }
 0x3e6   :  { %v900_v55 = vpop.permute.xlu0 %899 }
 0x3e7   :  { %v934_v56 = vsel %vm3356_vm15, %v933_v51, %v900_v55  ;;  %vm3359_vm15 = vcmask 719872   ;;  %v993_v51 = vpop.permute.xlu2 %992 }
 0x3ed   :  { %v960_v32 = vpop.permute.xlu1 %959 }
 0x3ee   :  { %v903_v57 = vpop.permute.xlu0 %902 }
 0x3ef   :  { %v935_v58 = vsel %vm3357_vm10, %v934_v56, %v903_v57  ;;  %vm3358_vm10 = vmmov %vm3353_vm14 }
 0x3f0   :  { %vm3360_vm14 = vmmov %vm3354_vm1  ;;  %vm3361_vm1 = vcmask 785408  }
 0x3f5   :  { %v963_v60 = vpop.permute.xlu1 %962 }
 0x3f6   :  { %v906_v61 = vpop.permute.xlu0 %905 }
 0x3f7   :  { %v936_v63 = vsel %vm3328_vm4, %v935_v58, %v906_v61  ;;  %vm3363_vm4 = vcmask 392192  }
 0x3fd   :  { %v966_v0 = vpop.permute.xlu1 %965 }
 0x3fe   :  { %v909_v50 = vpop.permute.xlu0 %908 }
 0x3ff   :  { %v937_v1 = vsel %vm3327_vm2, %v936_v63, %v909_v50  ;;  %vm3362_vm2 = vcmask 850944  }
 0x405   :  { %v969_v2 = vpop.permute.xlu1 %968 }
 0x406   :  { %v912_v3 = vpop.permute.xlu0 %911 }
 0x407   :  { %v938_v19 = vsel %vm3331_vm7, %v937_v1, %v912_v3  ;;  %vm3366_vm7 = vcmask 457728   ;;  %v1060_v3 = vpop.permute.xlu2 %1059 }
 0x40d   :  { %v972_v5 = vpop.permute.xlu1 %971 }
 0x40e   :  { %v915_v6 = vpop.permute.xlu0 %914 }
 0x40f   :  { %v939_v21 = vsel %vm3359_vm15, %v938_v19, %v915_v6  ;;  %vm3368_vm15 = vcmask 982016  }
 0x415   :  { %v975_v8 = vpop.permute.xlu1 %974 }
 0x416   :  { %v918_v7 = vpop.permute.xlu0 %917 }
 0x417   :  { %v940_v23 = vsel %vm3361_vm1, %v939_v21, %v918_v7  ;;  %vm3375_vm1 = vcmask 719872  }
 0x41d   :  { %v978_v10 = vpop.permute.xlu1 %977 }
 0x41e   :  { %v921_v9 = vpop.permute.xlu0 %920 }
 0x41f   :  { %v941_v25 = vsel %vm3362_vm2, %v940_v23, %v921_v9 }
 0x425   :  { %v981_v12 = vpop.permute.xlu1 %980 }
 0x426   :  { %v924_v11 = vpop.permute.xlu0 %923 }
 0x42d   :  { %v984_v14 = vpop.permute.xlu1 %983 }
 0x42e   :  { %v927_v13 = vpop.permute.xlu0 %926 }
 0x435   :  { %v987_v46 = vpop.permute.xlu1 %986 }
 0x436   :  { %v951_v16 = vpop.permute.xlu0 %950 }
 0x437   :  { %v995_v17 = vsel %vm3329_vm9, %v2870_v26, %v951_v16  ;;  %vm3364_vm9 = vmmov %vm3363_vm4 }
 0x438   :  { %v996_v18 = vsel %vm3330_vm3, %v995_v17, %v954_v15  ;;  %v1067_v26 = vsel %vm3364_vm9, %v2858_v62, %v2898_v29  ;;  %vm3365_vm3 = vcmask 916480  }
 0x439   :  { %v997_v20 = vsel %vm3358_vm10, %v996_v18, %v957_v52  ;;  %v942_v37 = vsel %vm3365_vm3, %v941_v25, %v924_v11  ;;  %vm3367_vm10 = vmmov %vm3366_vm7  ;;  %vm3373_vm3 = vcmask 654336  }
 0x43a   :  { %v998_v22 = vsel %vm3360_vm14, %v997_v20, %v960_v32  ;;  %v1068_v41 = vsel %vm3367_vm10, %v1067_v26, %v2905_v27  ;;  %v943_v43 = vsel %vm3368_vm15, %v942_v37, %v927_v13  ;;  %vm3369_vm14 = vcmask 523264  }
 0x43b   :  { %v999_v24 = vsel %vm3355_vm13, %v998_v22, %v963_v60  ;;  %vm3370_vm2 = vmmov %vm3369_vm14  ;;  %v944_v55 = vperm.slane %v943_v43, 0  ;;  %vm3377_vm10 = vcmask 785408   ;;  %vm3378_vm15 = vcmask 850944  }
 0x43c   :  { %v1000_v36 = vsel %vm3363_vm4, %v999_v24, %v966_v0  ;;  %v1069_v49 = vsel %vm3370_vm2, %v1068_v41, %v2911_v28  ;;  %vm3371_vm4 = vcmask 588800   ;;  %vm3376_vm13 = vmmov %vm3375_vm1 }
 0x43d   :  { %v1001_v38 = vsel %vm3366_vm7, %v1000_v36, %v969_v2  ;;  %vm3372_vm9 = vmmov %vm3371_vm4  ;;  %v945_v60 = vmul.f32 %v944_v55, %v2731_v44  ;;  %v947_v63 = vmul.f32 %v944_v55, %v2733_v39  ;;  %v948_v0 = vmul.f32 %v944_v55, %v2738_v53  ;;  %v1057_v1 = vpop.permute.xlu1 %1056 }
 0x43e   :  { %v1002_v47 = vsel %vm3369_vm14, %v1001_v38, %v972_v5  ;;  %v990_v48 = vpop.permute.xlu0 %989  ;;  %v1070_v62 = vsel %vm3372_vm9, %v1069_v49, %v2916_v31  ;;  %vm3374_vm7 = vmmov %vm3373_vm3  ;;  %vm3379_vm14 = vcmask 916480  }
 0x43f   :  { %v1003_v52 = vsel %vm3371_vm4, %v1002_v47, %v975_v8  ;;  %v1071_v27 = vsel %vm3374_vm7, %v1070_v62, %v2922_v33  ;;  %vm3380_vm2 = vmmov %vm3377_vm10  ;;  %vm3381_vm4 = vcmask 982016   ;;  %v946_v33 = vmul.f32 %v944_v55, %v2729_v42  ;;  %v2395_v55 = vld [vmem:[%s3315_s2 + $0x38] sm:$0xff] }
 0x440   :  { %v1004_v29 = vsel %vm3373_vm3, %v1003_v52, %v978_v10  ;;  %v1072_v32 = vsel %vm3376_vm13, %v1071_v27, %v2930_v35  ;;  %vm3382_vm9 = vmmov %vm3378_vm15  ;;  %1452 = vmatpush.bf16.msra.mxu1 %v2395_v55 }
 0x441   :  { %v1005_v56 = vsel %vm3375_vm1, %v1004_v29, %v981_v12  ;;  %v1073_v31 = vsel %vm3380_vm2, %v1072_v32, %v2928_v34  ;;  %vm3383_vm3 = vmmov %vm3379_vm14  ;;  %v2404_v32 = vld [vmem:[%s3315_s2 + $0x80] sm:$0xff] }
 0x442   :  { %v1006_v57 = vsel %vm3377_vm10, %v1005_v56, %v984_v14  ;;  %vm3384_vm7 = vmmov %vm3381_vm4  ;;  %v2393_v56 = vld [vmem:[%s3315_s2 + $0x28] sm:$0xff]  ;;  %1336 = vmatpush.bf16.msrb.mxu0 %v2404_v32 }
 0x443   :  { %v1007_v28 = vsel %vm3378_vm15, %v1006_v57, %v987_v46  ;;  %v2392_v57 = vld [vmem:[%s3315_s2 + $0x20] sm:$0xff] }
 0x444   :  { %v1008_v58 = vsel %vm3379_vm14, %v1007_v28, %v990_v48  ;;  %1453 = vmatpush.bf16.msra.mxu1 %v2394_v30  ;;  %v2391_v28 = vld [vmem:[%s3315_s2 + $0x18] sm:$0xff] }
 0x445   :  { %v1009_v61 = vsel %vm3381_vm4, %v1008_v58, %v993_v51  ;;  %v2403_v58 = vld [vmem:[%s3315_s2 + $0x78] sm:$0xff] }
 0x446   :  { %v1010_v35 = vperm.slane %v1009_v61, 0  ;;  %v1054_v50 = vpop.permute.xlu0 %1053  ;;  %1337 = vmatpush.bf16.msrb.mxu0 %v2403_v58  ;;  %v2402_v61 = vld [vmem:[%s3315_s2 + $0x70] sm:$0xff] }
 0x447   :  { %v1074_v2 = vsel %vm3382_vm9, %v1073_v31, %v1054_v50  ;;  %v2390_v31 = vld [vmem:[%s3315_s2 + $0x10] sm:$0xff]  ;;  %v2388_v50 = vld [vmem:[%s3315_s2] sm:$0xff] }
 0x448   :  { %v1011_v5 = vadd.f32 %v1010_v35, %v945_v60  ;;  %v1012_v6 = vadd.f32 %v1010_v35, %v946_v33  ;;  %v1013_v7 = vadd.f32 %v1010_v35, %v947_v63  ;;  %v1014_v34 = vadd.f32 %v1010_v35, %v948_v0  ;;  %1454 = vmatpush.bf16.msra.mxu1 %v2393_v56  ;;  %v2405_v60 = vld [vmem:[%s3315_s2 + $0x88] sm:$0xff] }
 0x449   :  { %v1075_v44 = vsel %vm3383_vm3, %v1074_v2, %v1057_v1  ;;  %v2389_v33 = vld [vmem:[%s3315_s2 + $0x8] sm:$0xff]  ;;  %1362 = vmatpush.bf16.msrb.mxu2 %v2405_v60  ;;  %2415 = vmatpush.bf16.msra.mxu3 %v2405_v60  ;;  %v2400_v2 = vld [vmem:[%s3315_s2 + $0x60] sm:$0xff] }
 0x44a   :  { %v1076_v8 = vsel %vm3384_vm7, %v1075_v44, %v1060_v3  ;;  %vm1079_vm1 = vcmp.ge.f32.partialorder %v1013_v7, 0.0  ;;  %vm1077_vm13 = vcmp.ge.f32.partialorder %v1011_v5, 0.0  ;;  %vm1078_vm10 = vcmp.ge.f32.partialorder %v1012_v6, 0.0  ;;  %1338 = vmatpush.bf16.msrb.mxu0 %v2402_v61  ;;  %v2401_v0 = vld [vmem:[%s3315_s2 + $0x68] sm:$0xff] }
 0x44b   :  { %v1081_v9 = vperm.slane %v1076_v8, 0  ;;  %vm1080_vm15 = vcmp.ge.f32.partialorder %v1014_v34, 0.0  ;;  %v2413_v3 = vld [vmem:[%s3315_s2 + $0xc8] sm:$0xff] }
 0x44c   :  { %1455 = vmatpush.bf16.msra.mxu1 %v2392_v57  ;;  %v1168_v44 = vld [vmem:[#allocation2 + $0x28] sm:$0x11] }
 0x44d   :  { %v1082_v42 = vmul.f32 %v1081_v9, %v1011_v5  ;;  %v1083_v10 = vmul.f32 %v1081_v9, %v1012_v6  ;;  %v1084_v39 = vmul.f32 %v1081_v9, %v1013_v7  ;;  %v1085_v11 = vmul.f32 %v1081_v9, %v1014_v34  ;;  %v2398_v9 = vld [vmem:[%s3315_s2 + $0x50] sm:$0xff] }
 0x44e   :  { %1339 = vmatpush.bf16.msrb.mxu0 %v2401_v0 }
 0x44f   :  { %v1088_v53 = vsel %vm1079_vm1, %v1013_v7, %v1084_v39  ;;  %v1086_v12 = vsel %vm1077_vm13, %v1011_v5, %v1082_v42  ;;  %v1087_v13 = vsel %vm1078_vm10, %v1012_v6, %v1083_v10  ;;  %v1089_v14 = vsel %vm1080_vm15, %v1014_v34, %v1085_v11  ;;  %v2399_v5 = vld [vmem:[%s3315_s2 + $0x58] sm:$0xff]  ;;  %v2412_v6 = vld [vmem:[%s3315_s2 + $0xc0] sm:$0xff]  ;;  %v2397_v39 = vld [vmem:[%s3315_s2 + $0x48] sm:$0xff] }
 0x450   :  { %v1092_v15 = vpack.c.bf16 %v1088_v53, %v1088_v53  ;;  %v1090_v16 = vpack.c.bf16 %v1086_v12, %v1086_v12  ;;  %v1091_v17 = vpack.c.bf16 %v1087_v13, %v1087_v13  ;;  %v1093_v18 = vpack.c.bf16 %v1089_v14, %v1089_v14  ;;  %1456 = vmatpush.bf16.msra.mxu1 %v2391_v28  ;;  %v2411_v42 = vld [vmem:[%s3315_s2 + $0xb8] sm:$0xff]  ;;  %v2410_v11 = vld [vmem:[%s3315_s2 + $0xb0] sm:$0xff]  ;;  %v2409_v53 = vld [vmem:[%s3315_s2 + $0xa8] sm:$0xff] }
 0x451   :  { %vm3399_vm10 = vcmask 195584   ;;  %vm3400_vm15 = vcmask 261120  }
 0x452   :  { %v1112_v19 = vshrl.u32 %v1092_v15, 16  ;;  %v1095_v20 = vshrl.u32 %v1090_v16, 16  ;;  %v1103_v21 = vshrl.u32 %v1091_v17, 16  ;;  %v1120_v22 = vshrl.u32 %v1093_v18, 16  ;;  %1340 = vmatpush.bf16.msrb.mxu0 %v2400_v2 }
 0x453   :  { %v1115_v24 = vshll.u32 %v1092_v15, 16  ;;  %v1098_v36 = vshll.u32 %v1090_v16, 16  ;;  %v1106_v37 = vshll.u32 %v1091_v17, 16  ;;  %v1123_v41 = vshll.u32 %v1093_v18, 16  ;;  %v2396_v16 = vld [vmem:[%s3315_s2 + $0x40] sm:$0xff]  ;;  %v2414_v17 = vld [vmem:[%s3315_s2 + $0xd0] sm:$0xff] }
 0x454   :  { %v1114_v23 = vrot.slane %v1112_v19, 7  ;;  %v1097_v25 = vrot.slane %v1095_v20, 7  ;;  %v1105_v26 = vrot.slane %v1103_v21, 7  ;;  %v1122_v38 = vrot.slane %v1120_v22, 7  ;;  %1457 = vmatpush.bf16.msra.mxu1 %v2390_v31  ;;  %v2408_v18 = vld [vmem:[%s3315_s2 + $0xa0] sm:$0xff]  ;;  %v1164_v19 = vld [vmem:[#allocation2 + $0x18] sm:$0xff]  ;;  %1478 = vmatpush.bf16.msrb.mxu3 %v2396_v16 }
 0x455   :  { %1629 = vmatpush.bf16.msra.mxu2 %v2414_v17 }
 0x456   :  { %v1117_v43 = vor.u32 %v1115_v24, %v1114_v23  ;;  %v1100_v46 = vor.u32 %v1098_v36, %v1097_v25  ;;  %v1101_v47 = vrot.slane %v1097_v25, 4  ;;  %v1118_v48 = vrot.slane %v1114_v23, 4  ;;  %1341 = vmatpush.bf16.msrb.mxu0 %v2399_v5  ;;  %v2444_v23 = vld [vmem:[#allocation2] sm:$0xff]  ;;  %v2407_v25 = vld [vmem:[%s3315_s2 + $0x98] sm:$0xff] }
 0x457   :  { %v1108_v49 = vor.u32 %v1106_v37, %v1105_v26  ;;  %v1125_v51 = vor.u32 %v1123_v41, %v1122_v38  ;;  %v1110_v29 = vrot.slane %v1105_v26, 4  ;;  %v1127_v27 = vrot.slane %v1122_v38, 4 }
 0x458   :  { %1134 = vrot.lane.b32.xlu1 %v1117_v43, %s2450_s27  ;;  %1128 = vrot.lane.b32.xlu0 %v1100_v46, %s2450_s27 }
 0x459   :  { %v1109_v52 = vsel %vm2536_vm11, %v1101_v47, %v1108_v49  ;;  %v1126_v62 = vsel %vm2536_vm11, %v1118_v48, %v1125_v51  ;;  %1458 = vmatpush.bf16.msra.mxu1 %v2389_v33  ;;  %vm3385_vm11 = vcmask 64512   ;;  %v1161_v49 = vld [vmem:[#allocation2 + $0x10] sm:$0x11] }
 0x45a   :  { %1130 = vrot.lane.b32.xlu2 %v1109_v52, %s2450_s27  ;;  %vm3386_vm14 = vmmov %vm3385_vm11  ;;  %1342 = vmatpush.bf16.msrb.mxu0 %v2398_v9 }
 0x45b   :  { %vm3387_vm2 = vmmov %vm3385_vm11 }
 0x45c   :  { %vm3388_vm4 = vmmov %vm3387_vm2 }
 0x45d   :  { %1459 = vmatpush.bf16.msra.mxu1 %v2388_v50  ;;  %vm3390_vm9 = vmmov %vm3387_vm2 }
 0x45e   :  { %1343 = vmatpush.bf16.msrb.mxu0 %v2397_v39  ;;  %vm3397_vm1 = vmmov %vm3387_vm2 }
 0x460   :  { %1132 = vrot.lane.b32.xlu1 %v1110_v29, %s2450_s27  ;;  %1136 = vrot.lane.b32.xlu0 %v1126_v62, %s2450_s27 }
 0x461   :  { %2416 = vmatpush.bf16.msrb.mxu1 %v2413_v3 }
 0x462   :  { %1138 = vrot.lane.b32.xlu2 %v1127_v27, %s2450_s27  ;;  %1603 = vmatpush.bf16.msra.mxu0 %v2413_v3 }
 0x465   :  { %2417 = vmatpush.bf16.msrb.mxu1 %v2412_v6 }
 0x466   :  { %1604 = vmatpush.bf16.msra.mxu0 %v2412_v6 }
 0x469   :  { %2418 = vmatpush.bf16.msrb.mxu1 %v2411_v42 }
 0x46a   :  { %1605 = vmatpush.bf16.msra.mxu0 %v2411_v42 }
 0x46d   :  { %2419 = vmatpush.bf16.msrb.mxu1 %v2410_v11 }
 0x46e   :  { %1606 = vmatpush.bf16.msra.mxu0 %v2410_v11 }
 0x471   :  { %2420 = vmatpush.bf16.msrb.mxu1 %v2409_v53 }
 0x472   :  { %1607 = vmatpush.bf16.msra.mxu0 %v2409_v53 }
 0x475   :  { %2421 = vmatpush.bf16.msrb.mxu1 %v2408_v18 }
 0x476   :  { %1608 = vmatpush.bf16.msra.mxu0 %v2408_v18 }
 0x479   :  { %2422 = vmatpush.bf16.msrb.mxu1 %v2407_v25 }
 0x47a   :  { %1609 = vmatpush.bf16.msra.mxu0 %v2407_v25 }
 0x47d   :  { %2423 = vmatpush.bf16.msrb.mxu1 %v2406_v45 }
 0x47e   :  { %1610 = vmatpush.bf16.msra.mxu0 %v2406_v45 }
 0x4b4   :  { %v1131_v63 = vpop.permute.xlu2 %1130 }
 0x4b5   :  { %v1141_v35 = vrot.slane %v1131_v63, 4 }
 0x4b7   :  { %v1147_v1 = vsel %vm3385_vm11, %v1141_v35, %v1131_v63  ;;  %vm3401_vm11 = vcmask 326656  }
 0x4b8   :  { %1160 = vst.msk [vmem:[#allocation2 + $0x8] sm:$0xff] %vm2613_vm12, %v1147_v1 }
 0x4bc   :  { %v1139_v7 = vpop.permute.xlu2 %1138 }
 0x4bd   :  { %v1145_v34 = vrot.slane %v1139_v7, 4 }
 0x4bf   :  { %v1151_v8 = vsel %vm3386_vm14, %v1145_v34, %v1139_v7  ;;  %v3087_v41 = vld [vmem:[#allocation2 + $0x8] sm:$0xff]  ;;  %vm3402_vm14 = vcmask 392192  }
 0x4c0   :  { %v1169_v10 = vsel %vm2634_vm0, %v1151_v8, %v1168_v44  ;;  %v1205_v62 = vshll.u32 %v3087_v41, 16  ;;  %v1209_v29 = vshrl.u32 %v3087_v41, 16  ;;  %v2385_v32 = vld [vmem:[#allocation2 + $0x4] sm:$0xf0] }
 0x4c1   :  { %1170 = vst [vmem:[#allocation2 + $0x28] sm:$0x11] %v1169_v10 }
 0x4c2   :  { %v1207_v58 = vrot.slane %v1205_v62, 5  ;;  %v1211_v31 = vrot.slane %v1209_v29, 4 }
 0x4c4   :  { %v1212_v63 = vor.u32 %v1211_v31, %v1207_v58 }
 0x4c6   :  { %v1213_v34 = vrot.slane %v1212_v63, 4 }
 0x4c8   :  { %v1194_v4 = vld [vmem:[#allocation2 + $0x28] sm:$0x11] }
 0x4c9   :  { %v1239_v3 = vshll.u32 %v1194_v4, 16  ;;  %v1508_v45 = vrot.slane %v1194_v4, 5 }
 0x4ca   :  { %v1135_v12 = vpop.permute.xlu1 %1134  ;;  %v1129_v13 = vpop.permute.xlu0 %1128 }
 0x4cb   :  { %v1143_v14 = vrot.slane %v1135_v12, 4  ;;  %v1140_v15 = vrot.slane %v1129_v13, 4  ;;  %v1241_v11 = vrot.slane %v1239_v3, 5 }
 0x4cd   :  { %v1149_v20 = vsel %vm3387_vm2, %v1143_v14, %v1135_v12  ;;  %v1146_v21 = vsel %vm3388_vm4, %v1140_v15, %v1129_v13  ;;  %vm3404_vm4 = vcmask 523264  }
 0x4ce   :  { %v1165_v22 = vsel %vm2570_vm6, %v1149_v20, %v1164_v19  ;;  %v1158_v24 = vsel %vm2570_vm6, %v1146_v21, %v2444_v23  ;;  %vm3389_vm6 = vmmov %vm3387_vm2  ;;  %v1498_v23 = vrot.slane %v3087_v41, 5  ;;  %vm3403_vm2 = vcmask 457728  }
 0x4cf   :  { %1166 = vst [vmem:[#allocation2 + $0x18] sm:$0xff] %v1165_v22  ;;  %v1196_v36 = vshrl.u32 %v1158_v24, 16  ;;  %v1199_v26 = vshll.u32 %v1158_v24, 16  ;;  %v1220_v55 = vshrl.u32 %v1165_v22, 16  ;;  %v1223_v30 = vshll.u32 %v1165_v22, 16 }
 0x4d0   :  { %1159 = vst [vmem:[#allocation2] sm:$0xff] %v1158_v24 }
 0x4d1   :  { %v1198_v47 = vrot.slane %v1196_v36, 4  ;;  %v1201_v48 = vrot.slane %v1199_v26, 5  ;;  %v1222_v60 = vrot.slane %v1220_v55, 4  ;;  %v1225_v61 = vrot.slane %v1223_v30, 5 }
 0x4d2   :  { %v1133_v37 = vpop.permute.xlu1 %1132  ;;  %v1137_v38 = vpop.permute.xlu0 %1136 }
 0x4d3   :  { %v1142_v43 = vrot.slane %v1133_v37, 4  ;;  %v1144_v46 = vrot.slane %v1137_v38, 4  ;;  %v1202_v28 = vor.u32 %v1201_v48, %v1198_v47  ;;  %v1226_v35 = vor.u32 %v1225_v61, %v1222_v60 }
 0x4d5   :  { %v1148_v51 = vsel %vm3389_vm6, %v1142_v43, %v1133_v37  ;;  %v1150_v52 = vsel %vm3390_vm9, %v1144_v46, %v1137_v38  ;;  %v1203_v33 = vrot.slane %v1202_v28, 4  ;;  %v1227_v8 = vrot.slane %v1226_v35, 4  ;;  %v2245_v28 = vld [vmem:[#allocation2 + $0x8] sm:$0xf0] }
 0x4d6   :  { %v1162_v27 = vsel %vm2634_vm0, %v1148_v51, %v1161_v49  ;;  %1167 = vst.msk [vmem:[#allocation2 + $0x20] sm:$0xff] %vm2613_vm12, %v1150_v52  ;;  %v2251_v19 = vld [vmem:[#allocation2 + $0x18] sm:$0xf]  ;;  %vm3391_vm12 = vcmask 130048   ;;  %v1500_v37 = vrot.slane %v1498_v23, 4  ;;  %vm3405_vm6 = vcmask 588800  }
 0x4d7   :  { %1163 = vst [vmem:[#allocation2 + $0x10] sm:$0x11] %v1162_v27  ;;  %v2243_v56 = vld [vmem:[#allocation2] sm:$0xf]  ;;  %v1208_v5 = vsel %vm2689_vm5, %v1203_v33, %v1207_v58  ;;  %vm3392_vm0 = vmmov %vm3391_vm12  ;;  %v1491_v43 = vld [vmem:[#allocation2 + $0x18] sm:$0xee] }
 0x4d8   :  { %v2244_v57 = vor.u32 %v2385_v32, %v2243_v56  ;;  %v1262_v10 = vunpack.c.l.b16 %v1208_v5  ;;  %v1263_v39 = vunpack.c.h.b16 %v1208_v5  ;;  %v1490_v36 = vld [vmem:[#allocation2] sm:$0xee]  ;;  %v2296_v48 = vrot.slane %v1491_v43, 9  ;;  %vm3394_vm3 = vmmov %vm3392_vm0 }
 0x4d9   :  { %v2295_v38 = vrot.slane %v1490_v36, 9  ;;  %v2384_v32 = vld [vmem:[#allocation2 + $0x4] sm:$0xf]  ;;  %vm3396_vm7 = vmmov %vm3392_vm0  ;;  %vm3406_vm9 = vcmask 654336  }
 0x4da   :  { %1460 = vmatmul.bf16.vlgmr.msra.gmra.mxu1 %v2244_v57  ;;  %v2248_v58 = vor.u32 %v2384_v32, %v2245_v28  ;;  %vm3398_vm13 = vmmov %vm3392_vm0 }
 0x4db   :  { %v1499_v47 = vsel %vm2713_vm8, %v2295_v38, %v1498_v23 }
 0x4dc   :  { %v1530_v29 = vunpack.c.h.b16 %v1499_v47  ;;  %v1529_v40 = vunpack.c.l.b16 %v1499_v47 }
 0x4dd   :  { %v1174_v59 = vld [vmem:[#allocation2 + $0x20] sm:$0xff] }
 0x4de   :  { %v1193_v0 = vld [vmem:[#allocation2 + $0x10] sm:$0x11]  ;;  %v1229_v50 = vshll.u32 %v1174_v59, 16  ;;  %v1233_v1 = vshrl.u32 %v1174_v59, 16  ;;  %v2387_v15 = vld [vmem:[#allocation2 + $0x1c] sm:$0xf0] }
 0x4df   :  { %v1215_v2 = vshll.u32 %v1193_v0, 16  ;;  %v2252_v22 = vor.u32 %v2387_v15, %v2251_v19  ;;  %v1505_v25 = vrot.slane %v1174_v59, 5  ;;  %v1501_v26 = vrot.slane %v1193_v0, 5  ;;  %v2253_v63 = vld [vmem:[#allocation2 + $0x20] sm:$0xf0] }
 0x4e0   :  { %v1231_v6 = vrot.slane %v1229_v50, 5  ;;  %v1235_v7 = vrot.slane %v1233_v1, 4  ;;  %v2386_v59 = vld [vmem:[#allocation2 + $0x1c] sm:$0xf] }
 0x4e1   :  { %v1217_v44 = vrot.slane %v1215_v2, 5  ;;  %v1507_v54 = vrot.slane %v1505_v25, 4  ;;  %v1502_v46 = vsel %vm2713_vm8, %v1500_v37, %v1501_v26  ;;  %v1506_v52 = vsel %vm2713_vm8, %v2296_v48, %v1505_v25 }
 0x4e2   :  { %v1236_v9 = vor.u32 %v1235_v7, %v1231_v6  ;;  %v1232_v13 = vsel %vm2689_vm5, %v1227_v8, %v1231_v6  ;;  %v1532_v51 = vunpack.c.h.b16 %v1502_v46  ;;  %v1533_v56 = vunpack.c.l.b16 %v1506_v52 }
 0x4e3   :  { %v1218_v42 = vsel %vm2689_vm5, %v1213_v34, %v1217_v44  ;;  %v1267_v20 = vunpack.c.h.b16 %v1232_v13  ;;  %v1509_v41 = vsel %vm2713_vm8, %v1507_v54, %v1508_v45  ;;  %v1266_v62 = vunpack.c.l.b16 %v1232_v13  ;;  %vm3395_vm8 = vmmov %vm3392_vm0 }
 0x4e4   :  { %v1264_v53 = vunpack.c.l.b16 %v1218_v42  ;;  %v1265_v12 = vunpack.c.h.b16 %v1218_v42  ;;  %v1237_v14 = vrot.slane %v1236_v9, 4  ;;  %v1535_v27 = vunpack.c.l.b16 %v1509_v41 }
 0x4e5   :  { %v1538_v30 = vpack.c.b16 %v1532_v51, %v1530_v29  ;;  %v1531_v31 = vunpack.c.l.b16 %v1502_v46  ;;  %v1536_v60 = vunpack.c.h.b16 %v1509_v41  ;;  %v1534_v61 = vunpack.c.h.b16 %v1506_v52 }
 0x4e6   :  { %v1270_v16 = vpack.c.b16 %v1264_v53, %v1262_v10  ;;  %v1271_v17 = vpack.c.b16 %v1265_v12, %v1263_v39  ;;  %v1242_v18 = vsel %vm2689_vm5, %v1237_v14, %v1241_v11  ;;  %vm3393_vm5 = vmmov %vm3392_vm0  ;;  %v1539_v57 = vpack.c.b16 %v1535_v27, %v1533_v56 }
 0x4e7   :  { %v1269_v21 = vunpack.c.h.b16 %v1242_v18  ;;  %v1268_v49 = vunpack.c.l.b16 %v1242_v18  ;;  %v1537_v33 = vpack.c.b16 %v1531_v31, %v1529_v40  ;;  %v1540_v4 = vpack.c.b16 %v1536_v60, %v1534_v61 }
 0x4e8   :  { %1344 = vmatmul.bf16.vlgmr.msrb.gmra.mxu0 %v1270_v16  ;;  %2239 = vmatmul.msk.bf16.vlgmr.msrb.gmra.mxu2 %vm3391_vm12, %v1271_v17  ;;  %v2256_v0 = vor.u32 %v2386_v59, %v2253_v63  ;;  %vm3407_vm12 = vcmask 719872  }
 0x4e9   :  { %v1273_v24 = vpack.c.b16 %v1269_v21, %v1267_v20  ;;  %v1272_v55 = vpack.c.b16 %v1268_v49, %v1266_v62 }
 0x4ea   :  { %1465 = vmatmul.bf16.gmra.mxu1 %v2252_v22 }
 0x4eb   :  { %2240 = vmatmul.msk.bf16.vlgmr.msra.gmra.mxu3 %vm3392_vm0, %v1273_v24  ;;  %vm3408_vm0 = vcmask 785408  }
 0x4f8   :  { %1349 = vmatmul.bf16.gmra.mxu0 %v1272_v55  ;;  %2351 = vmatmul.msk.bf16.vlgmr.msra.gmra.mxu2 %vm3393_vm5, %v1538_v30  ;;  %vm3409_vm5 = vcmask 850944  }
 0x4fa   :  { %1616 = vmatmul.bf16.vlgmr.msrb.gmra.mxu1 %v1539_v57 }
 0x4fb   :  { %2293 = vmatmul.msk.bf16.vlgmr.msrb.gmra.mxu3 %vm3394_vm3, %v2248_v58  ;;  %vm3410_vm3 = vcmask 916480  }
 0x508   :  { %1611 = vmatmul.bf16.vlgmr.msra.gmra.mxu0 %v1537_v33  ;;  %2352 = vmatmul.msk.bf16.gmra.mxu2 %vm3395_vm8, %v1540_v4  ;;  %vm3411_vm8 = vcmask 982016  }
 0x50b   :  { %2294 = vmatmul.msk.bf16.gmra.mxu3 %vm3396_vm7, %v2256_v0 }
 0x557   :  { %v1461_v35 = vpop.f32.mrf.mxu1 }
 0x55f   :  { %v1463_v3 = vpop.f32.mrf.mxu1 }
 0x565   :  { %v1345_v50 = vpop.f32.mrf.mxu0 }
 0x567   :  { %v1466_v44 = vpop.f32.mrf.mxu1 }
 0x56b   :  { %v1364_v1 = vpop.f32.mrf.mxu2 }
 0x56c   :  { %v1365_v13 = vadd.f32 %v1364_v1, %v1345_v50 }
 0x56d   :  { %v1347_v2 = vpop.f32.mrf.mxu0 }
 0x56e   :  { %v1369_v5 = vpop.f32.mrf.mxu3  ;;  %v1462_v21 = vadd.f32 %v1461_v35, %v1365_v13 }
 0x56f   :  { %v1468_v10 = vpop.f32.mrf.mxu1 }
 0x573   :  { %v1366_v6 = vpop.f32.mrf.mxu2 }
 0x574   :  { %v1367_v12 = vadd.f32 %v1366_v6, %v1347_v2 }
 0x575   :  { %v1350_v7 = vpop.f32.mrf.mxu0 }
 0x576   :  { %v1371_v34 = vpop.f32.mrf.mxu3  ;;  %v1370_v14 = vadd.f32 %v1369_v5, %v1350_v7  ;;  %v1464_v17 = vadd.f32 %v1463_v3, %v1367_v12 }
 0x577   :  { %v1617_v16 = vpop.f32.mrf.mxu1 }
 0x578   :  { %v1467_v24 = vadd.f32 %v1466_v44, %v1370_v14 }
 0x57b   :  { %v1631_v8 = vpop.f32.mrf.mxu2 }
 0x57d   :  { %v1352_v9 = vpop.f32.mrf.mxu0 }
 0x57e   :  { %v1480_v42 = vpop.f32.mrf.mxu3  ;;  %v1372_v25 = vadd.f32 %v1371_v34, %v1352_v9 }
 0x57f   :  { %v1481_v36 = vadd.f32 %v1480_v42, %v1462_v21  ;;  %v1619_v48 = vpop.f32.mrf.mxu1 }
 0x580   :  { %v1469_v47 = vadd.f32 %v1468_v10, %v1372_v25 }
 0x583   :  { %v1633_v39 = vpop.f32.mrf.mxu2 }
 0x585   :  { %v1612_v11 = vpop.f32.mrf.mxu0 }
 0x586   :  { %v1482_v53 = vpop.f32.mrf.mxu3  ;;  %v1632_v22 = vadd.f32 %v1631_v8, %v1612_v11 }
 0x587   :  { %v1483_v23 = vadd.f32 %v1482_v53, %v1464_v17 }
 0x588   :  { %v3125_v38 = vadd.f32 %v1632_v22, %v1481_v36 }
 0x58b   :  { %v1636_v15 = vpop.f32.mrf.mxu2 }
 0x58c   :  { %v1637_v54 = vadd.f32 %v1636_v15, %v1617_v16 }
 0x58d   :  { %v1614_v18 = vpop.f32.mrf.mxu0 }
 0x58e   :  { %v1634_v19 = vadd.f32 %v1633_v39, %v1614_v18  ;;  %v1485_v20 = vpop.f32.mrf.mxu3 }
 0x58f   :  { %v1486_v37 = vadd.f32 %v1485_v20, %v1467_v24 }
 0x590   :  { %v3123_v26 = vadd.f32 %v1634_v19, %v1483_v23 }
 0x591   :  { %v3129_v45 = vadd.f32 %v1637_v54, %v1486_v37 }
 0x592   :  { %v1647_v46 = vadd.f32 %v3123_v26, %v3125_v38 }
 0x593   :  { %v1638_v43 = vpop.f32.mrf.mxu2 }
 0x594   :  { %v1639_v49 = vadd.f32 %v1638_v43, %v1619_v48  ;;  %v1648_v52 = vadd.f32 %v1647_v46, %v3129_v45 }
 0x596   :  { %v1487_v41 = vpop.f32.mrf.mxu3 }
 0x597   :  { %v1488_v51 = vadd.f32 %v1487_v41, %v1469_v47 }
 0x599   :  { %v3132_v62 = vadd.f32 %v1639_v49, %v1488_v51 }
 0x59b   :  { %v1649_v29 = vadd.f32 %v1648_v52, %v3132_v62 }
 0x59d   :  { %v1650_v27 = vrot.slane %v1649_v29, 4 }
 0x59f   :  { %v1651_v55 = vadd.f32 %v1650_v27, %v1649_v29 }
 0x5a1   :  { %v1652_v30 = vrot.slane %v1651_v55, 2 }
 0x5a3   :  { %v1653_v56 = vadd.f32 %v1652_v30, %v1651_v55 }
 0x5a5   :  { %v1654_v32 = vrot.slane %v1653_v56, 1 }
 0x5a7   :  { %v1655_v57 = vadd.f32 %v1654_v32, %v1653_v56 }
 0x5a9   :  { %1665 = vrot.lane.b32.xlu2 %v1655_v57, %s2451_s1  ;;  %1661 = vrot.lane.b32.xlu1 %v1655_v57, %s2452_s28 }
 0x5aa   :  { %1657 = vrot.lane.b32.xlu0 %v1655_v57, %s2453_s29 }
 0x5b1   :  { %1677 = vrot.lane.b32.xlu2 %v1655_v57, %s2454_s30  ;;  %1673 = vrot.lane.b32.xlu1 %v1655_v57, %s2455_s5 }
 0x5b2   :  { %1669 = vrot.lane.b32.xlu0 %v1655_v57, %s2456_s6 }
 0x5b9   :  { %1689 = vrot.lane.b32.xlu2 %v1655_v57, %s2457_s7  ;;  %1685 = vrot.lane.b32.xlu1 %v1655_v57, %s2458_s8 }
 0x5ba   :  { %1681 = vrot.lane.b32.xlu0 %v1655_v57, %s2459_s9 }
 0x5c1   :  { %1701 = vrot.lane.b32.xlu2 %v1655_v57, %s2460_s10  ;;  %1697 = vrot.lane.b32.xlu1 %v1655_v57, %s2461_s11 }
 0x5c2   :  { %1693 = vrot.lane.b32.xlu0 %v1655_v57, %s2462_s12 }
 0x5c9   :  { %1713 = vrot.lane.b32.xlu2 %v1655_v57, %s2450_s27  ;;  %1709 = vrot.lane.b32.xlu1 %v1655_v57, %s2463_s13 }
 0x5ca   :  { %1705 = vrot.lane.b32.xlu0 %v1655_v57, %s2464_s14 }
 0x603   :  { %v1666_v28 = vpop.permute.xlu2 %1665 }
 0x60b   :  { %v1678_v61 = vpop.permute.xlu2 %1677 }
 0x613   :  { %v1690_v1 = vpop.permute.xlu2 %1689 }
 0x61b   :  { %v1662_v58 = vpop.permute.xlu1 %1661  ;;  %v1702_v8 = vpop.permute.xlu2 %1701 }
 0x61c   :  { %v1658_v31 = vpop.permute.xlu0 %1657 }
 0x61d   :  { %v1660_v60 = vadd.f32 %v1658_v31, %v1655_v57 }
 0x61f   :  { %v1664_v40 = vadd.f32 %v1662_v58, %v1660_v60 }
 0x621   :  { %v1668_v4 = vadd.f32 %v1666_v28, %v1664_v40 }
 0x623   :  { %v1674_v33 = vpop.permute.xlu1 %1673  ;;  %v1714_v12 = vpop.permute.xlu2 %1713 }
 0x624   :  { %v1670_v63 = vpop.permute.xlu0 %1669 }
 0x625   :  { %v1672_v59 = vadd.f32 %v1670_v63, %v1668_v4 }
 0x627   :  { %v1676_v0 = vadd.f32 %v1674_v33, %v1672_v59 }
 0x629   :  { %v1680_v50 = vadd.f32 %v1678_v61, %v1676_v0 }
 0x62b   :  { %v1686_v35 = vpop.permute.xlu1 %1685 }
 0x62c   :  { %v1682_v2 = vpop.permute.xlu0 %1681 }
 0x62d   :  { %v1684_v3 = vadd.f32 %v1682_v2, %v1680_v50 }
 0x62f   :  { %v1688_v5 = vadd.f32 %v1686_v35, %v1684_v3 }
 0x631   :  { %v1692_v6 = vadd.f32 %v1690_v1, %v1688_v5 }
 0x633   :  { %v1698_v7 = vpop.permute.xlu1 %1697 }
 0x634   :  { %v1694_v34 = vpop.permute.xlu0 %1693 }
 0x635   :  { %v1696_v44 = vadd.f32 %v1694_v34, %v1692_v6 }
 0x637   :  { %v1700_v9 = vadd.f32 %v1698_v7, %v1696_v44 }
 0x639   :  { %v1704_v42 = vadd.f32 %v1702_v8, %v1700_v9 }
 0x63b   :  { %v1710_v11 = vpop.permute.xlu1 %1709 }
 0x63c   :  { %v1706_v10 = vpop.permute.xlu0 %1705 }
 0x63d   :  { %v1708_v39 = vadd.f32 %v1706_v10, %v1704_v42 }
 0x63f   :  { %v1712_v53 = vadd.f32 %v1710_v11, %v1708_v39 }
 0x641   :  { %v1716_v13 = vadd.f32 %v1714_v12, %v1712_v53 }
 0x643   :  { %v3150_v14 = vmul.f32 0.001953125, %v1716_v13 }
 0x645   :  { %1725 = vrot.lane.b32.xlu2 %v3150_v14, %s2464_s14  ;;  %1722 = vrot.lane.b32.xlu1 %v3150_v14, %s2463_s13 }
 0x646   :  { %1719 = vrot.lane.b32.xlu0 %v3150_v14, %s2450_s27 }
 0x64d   :  { %1734 = vrot.lane.b32.xlu2 %v3150_v14, %s2462_s12  ;;  %1731 = vrot.lane.b32.xlu1 %v3150_v14, %s2461_s11 }
 0x64e   :  { %1728 = vrot.lane.b32.xlu0 %v3150_v14, %s2460_s10 }
 0x655   :  { %1743 = vrot.lane.b32.xlu2 %v3150_v14, %s2459_s9  ;;  %1740 = vrot.lane.b32.xlu1 %v3150_v14, %s2458_s8 }
 0x656   :  { %1737 = vrot.lane.b32.xlu0 %v3150_v14, %s2457_s7 }
 0x65d   :  { %1752 = vrot.lane.b32.xlu2 %v3150_v14, %s2456_s6  ;;  %1749 = vrot.lane.b32.xlu1 %v3150_v14, %s2455_s5 }
 0x65e   :  { %1746 = vrot.lane.b32.xlu0 %v3150_v14, %s2454_s30 }
 0x665   :  { %1761 = vrot.lane.b32.xlu2 %v3150_v14, %s2453_s29  ;;  %1758 = vrot.lane.b32.xlu1 %v3150_v14, %s2452_s28 }
 0x666   :  { %1755 = vrot.lane.b32.xlu0 %v3150_v14, %s2451_s1 }
 0x69f   :  { %v1726_v15 = vpop.permute.xlu2 %1725 }
 0x6a7   :  { %v1735_v18 = vpop.permute.xlu2 %1734 }
 0x6af   :  { %v1744_v25 = vpop.permute.xlu2 %1743 }
 0x6b7   :  { %v1723_v16 = vpop.permute.xlu1 %1722  ;;  %v1753_v41 = vpop.permute.xlu2 %1752 }
 0x6b8   :  { %v1720_v17 = vpop.permute.xlu0 %1719 }
 0x6b9   :  { %v1764_v19 = vsel %vm3397_vm1, %v3150_v14, %v1720_v17 }
 0x6ba   :  { %v1765_v21 = vsel %vm3398_vm13, %v1764_v19, %v1723_v16 }
 0x6bb   :  { %v1766_v23 = vsel %vm3399_vm10, %v1765_v21, %v1726_v15  ;;  %vm3412_vm10 = vcmask 64512  }
 0x6bf   :  { %v1732_v20 = vpop.permute.xlu1 %1731  ;;  %v1762_v32 = vpop.permute.xlu2 %1761 }
 0x6c0   :  { %v1729_v22 = vpop.permute.xlu0 %1728 }
 0x6c1   :  { %v1767_v24 = vsel %vm3400_vm15, %v1766_v23, %v1729_v22  ;;  %vm3413_vm15 = vcmask 130048  }
 0x6c2   :  { %v1768_v36 = vsel %vm3401_vm11, %v1767_v24, %v1732_v20  ;;  %vm3414_vm11 = vcmask 195584  }
 0x6c3   :  { %v1769_v43 = vsel %vm3402_vm14, %v1768_v36, %v1735_v18  ;;  %vm3415_vm14 = vcmask 261120  }
 0x6c7   :  { %v1741_v37 = vpop.permute.xlu1 %1740 }
 0x6c8   :  { %v1738_v54 = vpop.permute.xlu0 %1737 }
 0x6c9   :  { %v1770_v46 = vsel %vm3403_vm2, %v1769_v43, %v1738_v54  ;;  %vm3416_vm2 = vcmask 326656  }
 0x6ca   :  { %v1771_v47 = vsel %vm3404_vm4, %v1770_v46, %v1741_v37  ;;  %vm3417_vm4 = vmmov %vm3412_vm10 }
 0x6cb   :  { %v1772_v51 = vsel %vm3405_vm6, %v1771_v47, %v1744_v25  ;;  %vm3418_vm6 = vcmask 392192  }
 0x6cf   :  { %v1750_v48 = vpop.permute.xlu1 %1749 }
 0x6d0   :  { %v1747_v49 = vpop.permute.xlu0 %1746 }
 0x6d1   :  { %v1773_v52 = vsel %vm3406_vm9, %v1772_v51, %v1747_v49  ;;  %vm3419_vm9 = vmmov %vm3413_vm15 }
 0x6d2   :  { %v1774_v29 = vsel %vm3407_vm12, %v1773_v52, %v1750_v48  ;;  %vm3420_vm12 = vcmask 457728  }
 0x6d3   :  { %v1775_v55 = vsel %vm3408_vm0, %v1774_v29, %v1753_v41  ;;  %vm3421_vm0 = vmmov %vm3414_vm11 }
 0x6d7   :  { %v1759_v27 = vpop.permute.xlu1 %1758 }
 0x6d8   :  { %v1756_v30 = vpop.permute.xlu0 %1755 }
 0x6d9   :  { %v1776_v56 = vsel %vm3409_vm5, %v1775_v55, %v1756_v30  ;;  %vm3422_vm5 = vcmask 523264  }
 0x6da   :  { %v1777_v57 = vsel %vm3410_vm3, %v1776_v56, %v1759_v27  ;;  %v1645_v56 = vld [vmem:[%s3314_s3 + $0x2] sm:$0x1]  ;;  %vm3423_vm3 = vmmov %vm3415_vm14 }
 0x6db   :  { %v1778_v28 = vsel %vm3411_vm8, %v1777_v57, %v1762_v32  ;;  %vm3424_vm8 = vcmask 588800  }
 0x6dc   :  { %v1779_v58 = vperm.slane %v1778_v28, 0 }
 0x6de   :  { %v1780_v31 = vsub.f32 %v3125_v38, %v1779_v58  ;;  %v1781_v60 = vsub.f32 %v3123_v26, %v1779_v58  ;;  %v1782_v40 = vsub.f32 %v3129_v45, %v1779_v58  ;;  %v1783_v61 = vsub.f32 %v3132_v62, %v1779_v58 }
 0x6e0   :  { %v1784_v33 = vmul.f32 %v1780_v31, %v1780_v31  ;;  %v1785_v4 = vmul.f32 %v1781_v60, %v1781_v60  ;;  %v1786_v63 = vmul.f32 %v1782_v40, %v1782_v40  ;;  %v1787_v0 = vmul.f32 %v1783_v61, %v1783_v61  ;;  %v1646_v31 = vld [vmem:[%s3314_s3 + $0x3] sm:$0x1] }
 0x6e2   :  { %v1788_v59 = vadd.f32 %v1785_v4, %v1784_v33 }
 0x6e4   :  { %v1789_v35 = vadd.f32 %v1788_v59, %v1786_v63 }
 0x6e6   :  { %v1790_v50 = vadd.f32 %v1789_v35, %v1787_v0 }
 0x6e8   :  { %v1791_v1 = vrot.slane %v1790_v50, 4 }
 0x6ea   :  { %v1792_v2 = vadd.f32 %v1791_v1, %v1790_v50 }
 0x6ec   :  { %v1793_v3 = vrot.slane %v1792_v2, 2 }
 0x6ee   :  { %v1794_v5 = vadd.f32 %v1793_v3, %v1792_v2 }
 0x6f0   :  { %v1795_v6 = vrot.slane %v1794_v5, 1 }
 0x6f2   :  { %v1796_v7 = vadd.f32 %v1795_v6, %v1794_v5 }
 0x6f4   :  { %1806 = vrot.lane.b32.xlu2 %v1796_v7, %s2451_s1  ;;  %1802 = vrot.lane.b32.xlu1 %v1796_v7, %s2452_s28 }
 0x6f5   :  { %1798 = vrot.lane.b32.xlu0 %v1796_v7, %s2453_s29 }
 0x6fc   :  { %1818 = vrot.lane.b32.xlu2 %v1796_v7, %s2454_s30  ;;  %1814 = vrot.lane.b32.xlu1 %v1796_v7, %s2455_s5 }
 0x6fd   :  { %1810 = vrot.lane.b32.xlu0 %v1796_v7, %s2456_s6 }
 0x704   :  { %1830 = vrot.lane.b32.xlu2 %v1796_v7, %s2457_s7  ;;  %1826 = vrot.lane.b32.xlu1 %v1796_v7, %s2458_s8 }
 0x705   :  { %1822 = vrot.lane.b32.xlu0 %v1796_v7, %s2459_s9 }
 0x70c   :  { %1842 = vrot.lane.b32.xlu2 %v1796_v7, %s2460_s10  ;;  %1838 = vrot.lane.b32.xlu1 %v1796_v7, %s2461_s11 }
 0x70d   :  { %1834 = vrot.lane.b32.xlu0 %v1796_v7, %s2462_s12 }
 0x714   :  { %1854 = vrot.lane.b32.xlu2 %v1796_v7, %s2450_s27  ;;  %1850 = vrot.lane.b32.xlu1 %v1796_v7, %s2463_s13 }
 0x715   :  { %1846 = vrot.lane.b32.xlu0 %v1796_v7, %s2464_s14 }
 0x74e   :  { %v1807_v34 = vpop.permute.xlu2 %1806 }
 0x756   :  { %v1819_v10 = vpop.permute.xlu2 %1818 }
 0x75e   :  { %v1831_v17 = vpop.permute.xlu2 %1830 }
 0x766   :  { %v1803_v44 = vpop.permute.xlu1 %1802  ;;  %v1843_v25 = vpop.permute.xlu2 %1842 }
 0x767   :  { %v1799_v8 = vpop.permute.xlu0 %1798 }
 0x768   :  { %v1801_v9 = vadd.f32 %v1799_v8, %v1796_v7 }
 0x76a   :  { %v1805_v42 = vadd.f32 %v1803_v44, %v1801_v9 }
 0x76c   :  { %v1809_v11 = vadd.f32 %v1807_v34, %v1805_v42 }
 0x76e   :  { %v1815_v39 = vpop.permute.xlu1 %1814  ;;  %v1855_v48 = vpop.permute.xlu2 %1854 }
 0x76f   :  { %v1811_v53 = vpop.permute.xlu0 %1810 }
 0x770   :  { %v1813_v12 = vadd.f32 %v1811_v53, %v1809_v11 }
 0x772   :  { %v1817_v13 = vadd.f32 %v1815_v39, %v1813_v12 }
 0x774   :  { %v1821_v16 = vadd.f32 %v1819_v10, %v1817_v13 }
 0x776   :  { %v1827_v15 = vpop.permute.xlu1 %1826 }
 0x777   :  { %v1823_v18 = vpop.permute.xlu0 %1822 }
 0x778   :  { %v1825_v19 = vadd.f32 %v1823_v18, %v1821_v16 }
 0x77a   :  { %v1829_v20 = vadd.f32 %v1827_v15, %v1825_v19 }
 0x77c   :  { %v1833_v21 = vadd.f32 %v1831_v17, %v1829_v20 }
 0x77e   :  { %v1839_v22 = vpop.permute.xlu1 %1838 }
 0x77f   :  { %v1835_v23 = vpop.permute.xlu0 %1834 }
 0x780   :  { %v1837_v24 = vadd.f32 %v1835_v23, %v1833_v21 }
 0x782   :  { %v1841_v36 = vadd.f32 %v1839_v22, %v1837_v24 }
 0x784   :  { %v1845_v37 = vadd.f32 %v1843_v25, %v1841_v36 }
 0x786   :  { %v1851_v46 = vpop.permute.xlu1 %1850 }
 0x787   :  { %v1847_v54 = vpop.permute.xlu0 %1846 }
 0x788   :  { %v1849_v43 = vadd.f32 %v1847_v54, %v1845_v37 }
 0x78a   :  { %v1853_v47 = vadd.f32 %v1851_v46, %v1849_v43 }
 0x78c   :  { %v1857_v41 = vadd.f32 %v1855_v48, %v1853_v47 }
 0x78e   :  { %v1858_v49 = vmul.f32 0.001953125, %v1857_v41 }
 0x790   :  { %v1859_v51 = vadd.f32 1e-05, %v1858_v49 }
 0x792   :  { %2442 = vrsqrt.f32 %v1859_v51  ;;  %vm1866_vm1 = vweird.f32 %v1859_v51 }
 0x798   :  { %v2443_v52 = vpop.eup %2442 }
 0x799   :  { %v1861_v29 = vmul.f32 %v2443_v52, %v1859_v51  ;;  %vm1867_vm7 = vweird.f32 %v2443_v52 }
 0x79a   :  { %vm1868_vm13 = vmor %vm1866_vm1, %vm1867_vm7  ;;  %vm3426_vm1 = vcmask 654336  }
 0x79b   :  { %v1862_v27 = vmul.f32 %v2443_v52, %v1861_v29  ;;  %vm3425_vm7 = vmmov %vm3416_vm2 }
 0x79d   :  { %v1863_v55 = vmul.f32 0.5, %v1862_v27 }
 0x79f   :  { %v1864_v30 = vsub.f32 1.5, %v1863_v55 }
 0x7a1   :  { %v1865_v32 = vmul.f32 %v2443_v52, %v1864_v30 }
 0x7a3   :  { %v1869_v57 = vsel %vm1868_vm13, %v2443_v52, %v1865_v32  ;;  %vm3427_vm13 = vmmov %vm3418_vm6 }
 0x7a4   :  { %v1870_v28 = vmul.f32 %v1869_v57, %v1645_v56 }
 0x7a6   :  { %1880 = vrot.lane.b32.xlu2 %v1870_v28, %s2464_s14  ;;  %1877 = vrot.lane.b32.xlu1 %v1870_v28, %s2463_s13  ;;  %v1871_v58 = vmul.f32 %v1870_v28, %v3150_v14 }
 0x7a7   :  { %1874 = vrot.lane.b32.xlu0 %v1870_v28, %s2450_s27 }
 0x7a8   :  { %v1872_v60 = vsub.f32 %v1646_v31, %v1871_v58 }
 0x7ae   :  { %1889 = vrot.lane.b32.xlu2 %v1870_v28, %s2462_s12  ;;  %1886 = vrot.lane.b32.xlu1 %v1870_v28, %s2461_s11 }
 0x7af   :  { %1883 = vrot.lane.b32.xlu0 %v1870_v28, %s2460_s10 }
 0x7b6   :  { %1898 = vrot.lane.b32.xlu2 %v1870_v28, %s2459_s9  ;;  %1895 = vrot.lane.b32.xlu1 %v1870_v28, %s2458_s8 }
 0x7b7   :  { %1892 = vrot.lane.b32.xlu0 %v1870_v28, %s2457_s7 }
 0x7be   :  { %1907 = vrot.lane.b32.xlu2 %v1870_v28, %s2456_s6  ;;  %1910 = vrot.lane.b32.xlu1 %v1870_v28, %s2451_s1 }
 0x7bf   :  { %1901 = vrot.lane.b32.xlu0 %v1870_v28, %s2454_s30 }
 0x7c6   :  { %1916 = vrot.lane.b32.xlu2 %v1870_v28, %s2453_s29  ;;  %1940 = vrot.lane.b32.xlu1 %v1872_v60, %s2450_s27 }
 0x7c7   :  { %1904 = vrot.lane.b32.xlu0 %v1870_v28, %s2455_s5 }
 0x7ce   :  { %1943 = vrot.lane.b32.xlu2 %v1872_v60, %s2463_s13  ;;  %1949 = vrot.lane.b32.xlu1 %v1872_v60, %s2460_s10 }
 0x7cf   :  { %1913 = vrot.lane.b32.xlu0 %v1870_v28, %s2452_s28 }
 0x7d6   :  { %1952 = vrot.lane.b32.xlu2 %v1872_v60, %s2461_s11  ;;  %1958 = vrot.lane.b32.xlu1 %v1872_v60, %s2457_s7 }
 0x7d7   :  { %1946 = vrot.lane.b32.xlu0 %v1872_v60, %s2464_s14 }
 0x7de   :  { %1961 = vrot.lane.b32.xlu2 %v1872_v60, %s2458_s8  ;;  %1964 = vrot.lane.b32.xlu1 %v1872_v60, %s2459_s9 }
 0x7df   :  { %1955 = vrot.lane.b32.xlu0 %v1872_v60, %s2462_s12 }
 0x7e6   :  { %1970 = vrot.lane.b32.xlu2 %v1872_v60, %s2455_s5  ;;  %1973 = vrot.lane.b32.xlu1 %v1872_v60, %s2456_s6 }
 0x7e7   :  { %1967 = vrot.lane.b32.xlu0 %v1872_v60, %s2454_s30 }
 0x7ee   :  { %1982 = vrot.lane.b32.xlu2 %v1872_v60, %s2453_s29  ;;  %1979 = vrot.lane.b32.xlu1 %v1872_v60, %s2452_s28 }
 0x7ef   :  { %1976 = vrot.lane.b32.xlu0 %v1872_v60, %s2451_s1 }
 0x800   :  { %v1881_v14 = vpop.permute.xlu2 %1880 }
 0x808   :  { %v1890_v40 = vpop.permute.xlu2 %1889 }
 0x810   :  { %v1899_v4 = vpop.permute.xlu2 %1898 }
 0x818   :  { %v1878_v61 = vpop.permute.xlu1 %1877  ;;  %v1908_v0 = vpop.permute.xlu2 %1907 }
 0x819   :  { %v1875_v33 = vpop.permute.xlu0 %1874 }
 0x81a   :  { %v1919_v34 = vsel %vm3412_vm10, %v1870_v28, %v1875_v33  ;;  %vm3428_vm10 = vcmask 719872  }
 0x81b   :  { %v1920_v44 = vsel %vm3413_vm15, %v1919_v34, %v1878_v61  ;;  %vm3429_vm15 = vmmov %vm3420_vm12 }
 0x81c   :  { %v1921_v42 = vsel %vm3414_vm11, %v1920_v44, %v1881_v14  ;;  %vm3430_vm11 = vcmask 785408  }
 0x820   :  { %v1887_v63 = vpop.permute.xlu1 %1886  ;;  %v1917_v2 = vpop.permute.xlu2 %1916 }
 0x821   :  { %v1884_v59 = vpop.permute.xlu0 %1883 }
 0x822   :  { %v1922_v10 = vsel %vm3415_vm14, %v1921_v42, %v1884_v59  ;;  %vm3431_vm14 = vmmov %vm3422_vm5 }
 0x823   :  { %v1923_v11 = vsel %vm3416_vm2, %v1922_v10, %v1887_v63  ;;  %vm3432_vm2 = vcmask 850944  }
 0x824   :  { %v1924_v15 = vsel %vm3418_vm6, %v1923_v11, %v1890_v40  ;;  %vm3434_vm6 = vmmov %vm3424_vm8 }
 0x828   :  { %v1896_v35 = vpop.permute.xlu1 %1895  ;;  %v1944_v7 = vpop.permute.xlu2 %1943 }
 0x829   :  { %v1893_v50 = vpop.permute.xlu0 %1892 }
 0x82a   :  { %v1925_v17 = vsel %vm3420_vm12, %v1924_v15, %v1893_v50  ;;  %vm3436_vm12 = vcmask 982016  }
 0x82b   :  { %v1926_v19 = vsel %vm3422_vm5, %v1925_v17, %v1896_v35  ;;  %vm3438_vm5 = vmmov %vm3430_vm11 }
 0x82c   :  { %v1927_v23 = vsel %vm3424_vm8, %v1926_v19, %v1899_v4 }
 0x830   :  { %v1911_v1 = vpop.permute.xlu1 %1910  ;;  %v1953_v39 = vpop.permute.xlu2 %1952 }
 0x831   :  { %v1902_v3 = vpop.permute.xlu0 %1901 }
 0x832   :  { %v1928_v36 = vsel %vm3426_vm1, %v1927_v23, %v1902_v3 }
 0x838   :  { %v1941_v5 = vpop.permute.xlu1 %1940  ;;  %v1962_v21 = vpop.permute.xlu2 %1961 }
 0x839   :  { %v1905_v6 = vpop.permute.xlu0 %1904  ;;  %v1985_v53 = vsel %vm3417_vm4, %v1872_v60, %v1941_v5  ;;  %vm3433_vm4 = vcmask 916480  }
 0x83a   :  { %v1986_v16 = vsel %vm3419_vm9, %v1985_v53, %v1944_v7  ;;  %v1929_v54 = vsel %vm3428_vm10, %v1928_v36, %v1905_v6  ;;  %vm3435_vm9 = vmmov %vm3426_vm1 }
 0x83b   :  { %v1930_v46 = vsel %vm3430_vm11, %v1929_v54, %v1908_v0  ;;  %vm3440_vm8 = vmmov %vm3433_vm4 }
 0x83c   :  { %v1931_v41 = vsel %vm3432_vm2, %v1930_v46, %v1911_v1  ;;  %v2445_v1 = vld [vmem:[%s3312_s0] sm:$0xff] }
 0x840   :  { %v1950_v8 = vpop.permute.xlu1 %1949  ;;  %v1971_v49 = vpop.permute.xlu2 %1970 }
 0x841   :  { %v1914_v9 = vpop.permute.xlu0 %1913 }
 0x842   :  { %v1932_v52 = vsel %vm3433_vm4, %v1931_v41, %v1914_v9 }
 0x843   :  { %v1933_v55 = vsel %vm3436_vm12, %v1932_v52, %v1917_v2 }
 0x844   :  { %v1934_v56 = vperm.slane %v1933_v55, 0 }
 0x846   :  { %v1935_v14 = vmul.f32 %v1934_v56, %v3125_v38  ;;  %v1936_v61 = vmul.f32 %v1934_v56, %v3123_v26  ;;  %v1937_v33 = vmul.f32 %v1934_v56, %v3129_v45  ;;  %v1938_v4 = vmul.f32 %v1934_v56, %v3132_v62  ;;  %v2446_v38 = vld [vmem:[%s3312_s0 + $0x8] sm:$0xff]  ;;  %v2447_v26 = vld [vmem:[%s3312_s0 + $0x10] sm:$0xff]  ;;  %v2448_v62 = vld [vmem:[%s3312_s0 + $0x18] sm:$0xff] }
 0x848   :  { %v1959_v12 = vpop.permute.xlu1 %1958  ;;  %v1983_v31 = vpop.permute.xlu2 %1982 }
 0x849   :  { %v1947_v13 = vpop.permute.xlu0 %1946 }
 0x84a   :  { %v1987_v18 = vsel %vm3421_vm0, %v1986_v16, %v1947_v13  ;;  %vm3437_vm0 = vmmov %vm3428_vm10 }
 0x84b   :  { %v1988_v20 = vsel %vm3423_vm3, %v1987_v18, %v1950_v8  ;;  %vm3439_vm3 = vmmov %vm3432_vm2 }
 0x84c   :  { %v1989_v25 = vsel %vm3425_vm7, %v1988_v20, %v1953_v39  ;;  %vm3441_vm7 = vmmov %vm3436_vm12 }
 0x850   :  { %v1965_v22 = vpop.permute.xlu1 %1964 }
 0x851   :  { %v1956_v24 = vpop.permute.xlu0 %1955 }
 0x852   :  { %v1990_v37 = vsel %vm3427_vm13, %v1989_v25, %v1956_v24 }
 0x853   :  { %v1991_v43 = vsel %vm3429_vm15, %v1990_v37, %v1959_v12 }
 0x854   :  { %v1992_v47 = vsel %vm3431_vm14, %v1991_v43, %v1962_v21 }
 0x855   :  { %v1993_v29 = vsel %vm3434_vm6, %v1992_v47, %v1965_v22 }
 0x858   :  { %v1974_v48 = vpop.permute.xlu1 %1973 }
 0x859   :  { %v1968_v51 = vpop.permute.xlu0 %1967 }
 0x85a   :  { %v1994_v27 = vsel %vm3435_vm9, %v1993_v29, %v1968_v51 }
 0x85b   :  { %v1995_v30 = vsel %vm3437_vm0, %v1994_v27, %v1971_v49 }
 0x85c   :  { %v1996_v57 = vsel %vm3438_vm5, %v1995_v30, %v1974_v48 }
 0x860   :  { %v1980_v32 = vpop.permute.xlu1 %1979 }
 0x861   :  { %v1977_v28 = vpop.permute.xlu0 %1976 }
 0x862   :  { %v1997_v58 = vsel %vm3439_vm3, %v1996_v57, %v1977_v28 }
 0x863   :  { %v1998_v60 = vsel %vm3440_vm8, %v1997_v58, %v1980_v32 }
 0x864   :  { %v1999_v40 = vsel %vm3441_vm7, %v1998_v60, %v1983_v31 }
 0x865   :  { %v2000_v63 = vperm.slane %v1999_v40, 0 }
 0x867   :  { %v2001_v59 = vadd.f32 %v2000_v63, %v1935_v14  ;;  %v2002_v0 = vadd.f32 %v2000_v63, %v1936_v61  ;;  %v2003_v35 = vadd.f32 %v2000_v63, %v1937_v33  ;;  %v2004_v50 = vadd.f32 %v2000_v63, %v1938_v4 }
 0x869   :  { %v2005_v2 = vadd.f32 %v2445_v1, %v2001_v59  ;;  %v2006_v3 = vadd.f32 %v2446_v38, %v2002_v0  ;;  %v2007_v45 = vadd.f32 %v2447_v26, %v2003_v35  ;;  %v2008_v5 = vadd.f32 %v2448_v62, %v2004_v50 }
 0x86b   :  { %2009 = vst [vmem:[%s3316_s4] sm:$0xff] %v2005_v2 }
 0x86c   :  { %2010 = vst [vmem:[%s3316_s4 + $0x8] sm:$0xff] %v2006_v3 }
 0x86d   :  { %2011 = vst [vmem:[%s3316_s4 + $0x10] sm:$0xff] %v2007_v45 }
 0x86e   :  { %2012 = vst [vmem:[%s3316_s4 + $0x18] sm:$0xff] %v2008_v5 }

</bundles_post_ra>
